<compile_context>
chip_gen: v6e
topology: v6e:2x2x1
jax: 0.10.0
libtpu: 0.0.40
codegen_flags: <defaults>
</compile_context>

<pallas_src>
import jax
import jax.numpy as jnp
from jax.experimental import pallas as pl
from jax.experimental.pallas import tpu as pltpu

# Row indices inside the packed (n_rows, Dmax) parameter slab handed to the kernel.
_R_GFN, _R_BFN = 0, 1                       # feature LayerNorm gamma / beta          (Din)
_R_B1, _R_G1, _R_BE1 = 2, 3, 4              # fc1 bias, LN1 gamma / beta              (H)
_R_B2, _R_G2, _R_BE2 = 5, 6, 7              # fc2 bias, LN2 gamma / beta              (H)
_R_GN, _R_BN = 8, 9                         # post-GRU LayerNorm gamma / beta         (H)
_R_BQ = 10                                  # stacked Q-head bias                     (nq)
_R_BGI = 11                                 # fused GRU input bias at lane offsets 0/P/2P:
                                            #   [b_ir+b_hr | b_iz+b_hz | b_in]        (3P)
_R_BHN = 12                                 # b_hn (stays inside r * (W_hn h + b_hn)) (H)
_N_VEC_ROWS = 13


def _layernorm(x, gamma, beta, eps=1e-5):
    """One-pass LayerNorm moments: E[x] and E[x^2] are independent XLU reductions,
    var = E[x^2] - E[x]^2.  Slightly less stable than the two-pass form (documented);
    fine at LayerNorm activation scales."""
    m1 = jnp.mean(x, axis=-1, keepdims=True)
    m2 = jnp.mean(x * x, axis=-1, keepdims=True)
    var = jnp.maximum(m2 - m1 * m1, 0.0)
    return (x - m1) * jax.lax.rsqrt(var + eps) * gamma + beta


def _layernorm_ref(x, gamma, beta, eps=1e-5):
    """Two-pass LayerNorm used only by the pure-JAX reference (kept independent)."""
    mu = jnp.mean(x, axis=-1, keepdims=True)
    var = jnp.mean(jnp.square(x - mu), axis=-1, keepdims=True)
    return (x - mu) * jax.lax.rsqrt(var + eps) * gamma + beta


def _critic_kernel(inp_ref, h0_ref, vec_ref, w1_ref, w2_ref, wi_ref, wh_ref, wq_ref,
                   q_ref, hfin_ref):
    TB, Din = inp_ref.shape
    B, H = h0_ref.shape
    T = TB // B                      # static Python int at trace time
    P = wi_ref.shape[1] // 3         # gate lane pitch: gates live at lane offsets 0, P, 2P
    nq = q_ref.shape[1]

    def vrow(r, w):                  # (1, w) row of the packed parameter slab
        return vec_ref[r:r + 1, 0:w]

    # ---- feature LayerNorm + MLP (fc1 -> ReLU -> LN, fc_h -> ReLU -> LN) over all T*B rows ----
    x = _layernorm(inp_ref[...], vrow(_R_GFN, Din), vrow(_R_BFN, Din))
    h = jnp.dot(x, w1_ref[...], preferred_element_type=jnp.float32) + vrow(_R_B1, H)
    h = _layernorm(jnp.maximum(h, 0.0), vrow(_R_G1, H), vrow(_R_BE1, H))
    h = jnp.dot(h, w2_ref[...], preferred_element_type=jnp.float32) + vrow(_R_B2, H)
    h = _layernorm(jnp.maximum(h, 0.0), vrow(_R_G2, H), vrow(_R_BE2, H))      # (TB, H)

    # ---- GRU input-side projections: ONE fused matmul for all three gates; biases prefolded
    #      at param prep (b_ir+b_hr, b_iz+b_hz, b_in) at lane offsets 0 / P / 2P. ----
    gi = jnp.dot(h, wi_ref[...], preferred_element_type=jnp.float32) + vrow(_R_BGI, 3 * P)

    wh = wh_ref[...]                                              # (H, 3P), lane-aligned gates
    b_hn = jnp.broadcast_to(vrow(_R_BHN, H), (B, H))              # hoisted once, not per step

    # ---- fully unrolled recurrence: ONE hidden-side matmul per step (vs. three before),
    #      lane-aligned gate slices, hidden states kept in vregs (no scratch stores). ----
    h_prev = h0_ref[...]
    outs = []
    for t in range(T):
        lo = t * B
        gh = jnp.dot(h_prev, wh, preferred_element_type=jnp.float32)          # (B, 3P)
        r = jax.nn.sigmoid(gi[lo:lo + B, 0:H] + gh[:, 0:H])
        z = jax.nn.sigmoid(gi[lo:lo + B, P:P + H] + gh[:, P:P + H])
        n = jnp.tanh(gi[lo:lo + B, 2 * P:2 * P + H] + r * (gh[:, 2 * P:2 * P + H] + b_hn))
        h_prev = (1.0 - z) * n + z * h_prev
        outs.append(h_prev)
    hfin_ref[...] = h_prev

    # ---- post-GRU LayerNorm + stacked Q heads, consumed per step from vreg-resident h_t
    #      (off the serial critical path; no (T*B, H) scratch round-trip). ----
    g_n = jnp.broadcast_to(vrow(_R_GN, H), (B, H))
    b_n = jnp.broadcast_to(vrow(_R_BN, H), (B, H))
    bq = jnp.broadcast_to(vrow(_R_BQ, nq), (B, nq))
    wq = wq_ref[...]
    for t in range(T):
        ro_t = _layernorm(outs[t], g_n, b_n)
        q_ref[t * B:(t + 1) * B, :] = (
            jnp.dot(ro_t, wq, preferred_element_type=jnp.float32) + bq)


def pack_params(params, lane_pitch=128):
    """One-time repack of module parameters into the kernel operand layout.

    * GRU gate weights/biases (PyTorch (r, z, n) column order) are placed at lane offsets
      0 / P / 2P with P = H rounded up to a 128-lane boundary (P == H when H is already a
      multiple of 128, i.e. no padding at production sizes).
    * b_ir+b_hr and b_iz+b_hz are folded into the fused input-projection bias; b_hn is NOT
      foldable (it sits inside r * (W_hn h + b_hn)) and gets its own slab row.
    * All (1, D) gammas/betas/biases go into a single (n_rows, Dmax) f32 slab.
    """
    Din, H = params["w1"].shape
    nq = params["wq"].shape[1]
    P = -(-H // lane_pitch) * lane_pitch
    Dv = max(Din, 3 * P, H, nq)

    def pack_gates(w):                      # (H, 3H) -> (H, 3P), gates at lane-P offsets
        out = jnp.zeros((w.shape[0], 3 * P), jnp.float32)
        for g in range(3):
            out = out.at[:, g * P:g * P + H].set(w[:, g * H:(g + 1) * H])
        return out

    bih, bhh = params["bih"][0], params["bhh"][0]                   # (3H,)
    b_gi = jnp.zeros((3 * P,), jnp.float32)
    b_gi = b_gi.at[0:H].set(bih[0:H] + bhh[0:H])                    # r: fold b_ir + b_hr
    b_gi = b_gi.at[P:P + H].set(bih[H:2 * H] + bhh[H:2 * H])        # z: fold b_iz + b_hz
    b_gi = b_gi.at[2 * P:2 * P + H].set(bih[2 * H:3 * H])           # n: input-side b_in only

    vec = jnp.zeros((_N_VEC_ROWS, Dv), jnp.float32)
    rows = [
        (_R_GFN, params["g_fn"][0]), (_R_BFN, params["b_fn"][0]),
        (_R_B1, params["b1"][0]), (_R_G1, params["g1"][0]), (_R_BE1, params["be1"][0]),
        (_R_B2, params["b2"][0]), (_R_G2, params["g2"][0]), (_R_BE2, params["be2"][0]),
        (_R_GN, params["g_n"][0]), (_R_BN, params["b_n"][0]),
        (_R_BQ, params["bq"][0]),
        (_R_BGI, b_gi),
        (_R_BHN, bhh[2 * H:3 * H]),
    ]
    for r, v in rows:
        vec = vec.at[r, :v.shape[0]].set(v)

    return dict(vec=vec, w1=params["w1"], w2=params["w2"],
                wi=pack_gates(params["wih"]), wh=pack_gates(params["whh"]),
                wq=params["wq"])


def _run_kernel(inp_flat, h0, packed):
    TB, _ = inp_flat.shape
    B, H = h0.shape
    nq = packed["wq"].shape[1]
    vmem = pl.BlockSpec(memory_space=pltpu.MemorySpace.VMEM)
    args = (inp_flat, h0, packed["vec"], packed["w1"], packed["w2"],
            packed["wi"], packed["wh"], packed["wq"])
    q_flat, h_final = pl.pallas_call(
        _critic_kernel,
        out_shape=(jax.ShapeDtypeStruct((TB, nq), jnp.float32),
                   jax.ShapeDtypeStruct((B, H), jnp.float32)),
        in_specs=[vmem] * len(args),
        out_specs=(vmem, vmem),
        compiler_params=pltpu.CompilerParams(
            # Tiny here, but raise the scoped default (16 MiB on v5e) so the same
            # fully-resident structure keeps compiling as TB / H scale up.
            vmem_limit_bytes=32 * 1024 * 1024),
    )(*args)
    return q_flat, h_final


def r_maddpg_critic_forward(central_obs, central_act, rnn_states, packed):
    """Mirrors R_MADDPG_Critic.forward. Returns ([q_values...], h_final)."""
    central_obs = jnp.asarray(central_obs, jnp.float32)
    central_act = jnp.asarray(central_act, jnp.float32)
    rnn_states = jnp.asarray(rnn_states, jnp.float32)
    no_sequence = False
    if central_obs.ndim == 2 and central_act.ndim == 2:
        no_sequence = True
        central_obs, central_act = central_obs[None], central_act[None]
    if rnn_states.ndim == 2:
        rnn_states = rnn_states[None]
    inp = jnp.concatenate([central_obs, central_act], axis=2)
    T, B, Din = inp.shape
    q_flat, h_final = _run_kernel(inp.reshape(T * B, Din), rnn_states[0], packed)
    q = q_flat.reshape(T, B, -1)                       # reshape + head split in XLA (free)
    q_values = [q[..., i:i + 1] for i in range(q.shape[-1])]
    if no_sequence:
        q_values = [qv[0, :, :] for qv in q_values]
    return q_values, h_final[None]                     # h_final: (1, B, H) like nn.GRU


def init_params(key, input_dim, hidden, num_q_outs):
    """Deterministic synthetic parameter init (not a checkpoint load).

    When loading real PyTorch weights: wih = weight_ih_l0.T, whh = weight_hh_l0.T (keeping the
    (r, z, n) column order), all Linear weights transposed to (in_features, out_features).
    """
    ks = jax.random.split(key, 12)
    H = hidden

    def u(k, shape, scale):
        return jax.random.uniform(k, shape, jnp.float32, -scale, scale)

    s_in = 1.0 / float(input_dim) ** 0.5
    s_h = 1.0 / float(H) ** 0.5
    return dict(
        g_fn=1.0 + 0.1 * u(ks[0], (1, input_dim), 1.0),
        b_fn=0.1 * u(ks[1], (1, input_dim), 1.0),
        w1=u(ks[2], (input_dim, H), s_in),
        b1=0.1 * u(ks[3], (1, H), 1.0),
        g1=jnp.ones((1, H), jnp.float32), be1=jnp.zeros((1, H), jnp.float32),
        w2=u(ks[4], (H, H), s_h),
        b2=0.1 * u(ks[5], (1, H), 1.0),
        g2=jnp.ones((1, H), jnp.float32), be2=jnp.zeros((1, H), jnp.float32),
        wih=u(ks[6], (H, 3 * H), s_h),
        whh=u(ks[7], (H, 3 * H), s_h),
        bih=0.1 * u(ks[8], (1, 3 * H), 1.0),
        bhh=0.1 * u(ks[9], (1, 3 * H), 1.0),
        g_n=jnp.ones((1, H), jnp.float32), b_n=jnp.zeros((1, H), jnp.float32),
        wq=u(ks[10], (H, num_q_outs), s_h),
        bq=0.1 * u(ks[11], (1, num_q_outs), 1.0),
    )


def reference_forward(central_obs, central_act, rnn_states, params):
    """Pure-JAX reference of the same forward pass (two-pass LayerNorm, HIGHEST-precision f32
    matmuls so a ~1e-4 comparison against the Pallas kernel is meaningful)."""
    hp = jax.lax.Precision.HIGHEST
    inp = jnp.concatenate([central_obs, central_act], axis=2)
    T, B, Din = inp.shape
    H = params["w1"].shape[1]
    x = inp.reshape(T * B, Din)
    x = _layernorm_ref(x, params["g_fn"], params["b_fn"])
    h = jnp.maximum(jnp.dot(x, params["w1"], precision=hp) + params["b1"], 0.0)
    h = _layernorm_ref(h, params["g1"], params["be1"])
    h = jnp.maximum(jnp.dot(h, params["w2"], precision=hp) + params["b2"], 0.0)
    h = _layernorm_ref(h, params["g2"], params["be2"])
    x_seq = h.reshape(T, B, H)

    def step(h_prev, x_t):
        gi = jnp.dot(x_t, params["wih"], precision=hp) + params["bih"]
        gh = jnp.dot(h_prev, params["whh"], precision=hp) + params["bhh"]
        r = jax.nn.sigmoid(gi[:, :H] + gh[:, :H])
        z = jax.nn.sigmoid(gi[:, H:2 * H] + gh[:, H:2 * H])
        n = jnp.tanh(gi[:, 2 * H:] + r * gh[:, 2 * H:])
        h_new = (1.0 - z) * n + z * h_prev
        return h_new, h_new

    h_last, outs = jax.lax.scan(step, rnn_states[0], x_seq)
    ro = _layernorm_ref(outs.reshape(T * B, H), params["g_n"], params["b_n"])
    q = jnp.dot(ro, params["wq"], precision=hp) + params["bq"]
    return q.reshape(T, B, -1), h_last


if __name__ == "__main__":
    key = jax.random.PRNGKey(0)
    T, B = 8, 4
    central_obs_dim, central_act_dim = 20, 12
    hidden_size, num_q_outs = 32, 2

    kp, ko, ka, kh = jax.random.split(key, 4)
    params = init_params(kp, central_obs_dim + central_act_dim, hidden_size, num_q_outs)
    packed = pack_params(params)      # one-time repack; all gate slicing/folding happens here
    central_obs = jax.random.normal(ko, (T, B, central_obs_dim), jnp.float32)
    central_act = jax.random.normal(ka, (T, B, central_act_dim), jnp.float32)
    rnn_states = jax.random.normal(kh, (1, B, hidden_size), jnp.float32)

    q_values, h_final = r_maddpg_critic_forward(central_obs, central_act, rnn_states, packed)
    q_values = [jax.block_until_ready(q) for q in q_values]
    h_final = jax.block_until_ready(h_final)

    assert len(q_values) == num_q_outs
    assert all(q.shape == (T, B, 1) for q in q_values)
    assert h_final.shape == (1, B, hidden_size)
    assert all(bool(jnp.all(jnp.isfinite(q))) for q in q_values)
    assert bool(jnp.all(jnp.isfinite(h_final)))

    # Tight numerical check (all-f32 kernel) against an independent pure-JAX reference; the
    # small margin over 1e-4 covers MXU summation order + EUP transcendental rounding.
    q_ref, h_ref = reference_forward(central_obs, central_act, rnn_states, params)
    q_kernel = jnp.concatenate(q_values, axis=-1)
    q_err = float(jnp.max(jnp.abs(q_kernel - q_ref)))
    h_err = float(jnp.max(jnp.abs(h_final[0] - h_ref)))
    assert bool(jnp.allclose(q_kernel, q_ref, atol=2e-4, rtol=2e-4)), f"q mismatch: {q_err}"
    assert bool(jnp.allclose(h_final[0], h_ref, atol=2e-4, rtol=2e-4)), f"h mismatch: {h_err}"

    print("KERNEL_OK")
</pallas_src>

<mosaic_0001>
module attributes {stable_mosaic.version = 11 : i64} {
  func.func @_critic_kernel(%arg0: memref<32x32xf32, #tpu.memory_space<vmem>>, %arg1: memref<4x32xf32, #tpu.memory_space<vmem>>, %arg2: memref<13x384xf32, #tpu.memory_space<vmem>>, %arg3: memref<32x32xf32, #tpu.memory_space<vmem>>, %arg4: memref<32x32xf32, #tpu.memory_space<vmem>>, %arg5: memref<32x384xf32, #tpu.memory_space<vmem>>, %arg6: memref<32x384xf32, #tpu.memory_space<vmem>>, %arg7: memref<32x2xf32, #tpu.memory_space<vmem>>, %arg8: memref<32x2xf32, #tpu.memory_space<vmem>>, %arg9: memref<4x32xf32, #tpu.memory_space<vmem>>) attributes {dimension_semantics = [], scalar_prefetch = 0 : i64, scratch_operands = 0 : i64, tpu.core_type = #tpu.core_type<tc>} {
    %c0 = arith.constant 0 : index
    %c0_0 = arith.constant 0 : index
    %0 = vector.load %arg0[%c0, %c0_0] : memref<32x32xf32, #tpu.memory_space<vmem>>, vector<32x32xf32>
    %c0_1 = arith.constant 0 : index
    %c0_2 = arith.constant 0 : index
    %1 = vector.load %arg2[%c0_1, %c0_2] : memref<13x384xf32, #tpu.memory_space<vmem>>, vector<1x32xf32>
    %c1 = arith.constant 1 : index
    %c0_3 = arith.constant 0 : index
    %2 = vector.load %arg2[%c1, %c0_3] : memref<13x384xf32, #tpu.memory_space<vmem>>, vector<1x32xf32>
    %cst = arith.constant dense<0.000000e+00> : vector<32xf32>
    %3 = vector.multi_reduction <add>, %0, %cst [1] : vector<32x32xf32> to vector<32xf32>
    %4 = vector.shape_cast %3 : vector<32xf32> to vector<32x1xf32>
    %cst_4 = arith.constant 3.200000e+01 : f32
    %5 = vector.broadcast %cst_4 : f32 to vector<32x1xf32>
    %6 = arith.divf %4, %5 : vector<32x1xf32>
    %7 = arith.mulf %0, %0 : vector<32x32xf32>
    %cst_5 = arith.constant dense<0.000000e+00> : vector<32xf32>
    %8 = vector.multi_reduction <add>, %7, %cst_5 [1] : vector<32x32xf32> to vector<32xf32>
    %9 = vector.shape_cast %8 : vector<32xf32> to vector<32x1xf32>
    %cst_6 = arith.constant 3.200000e+01 : f32
    %10 = vector.broadcast %cst_6 : f32 to vector<32x1xf32>
    %11 = arith.divf %9, %10 : vector<32x1xf32>
    %12 = arith.mulf %6, %6 : vector<32x1xf32>
    %13 = arith.subf %11, %12 : vector<32x1xf32>
    %cst_7 = arith.constant 0.000000e+00 : f32
    %14 = vector.broadcast %cst_7 : f32 to vector<32x1xf32>
    %15 = arith.maximumf %13, %14 : vector<32x1xf32>
    %16 = vector.broadcast %6 : vector<32x1xf32> to vector<32x32xf32>
    %17 = arith.subf %0, %16 : vector<32x32xf32>
    %cst_8 = arith.constant 9.99999974E-6 : f32
    %18 = vector.broadcast %cst_8 : f32 to vector<32x1xf32>
    %19 = arith.addf %15, %18 : vector<32x1xf32>
    %20 = math.rsqrt %19 : vector<32x1xf32>
    %21 = vector.broadcast %20 : vector<32x1xf32> to vector<32x32xf32>
    %22 = arith.mulf %17, %21 : vector<32x32xf32>
    %23 = vector.broadcast %1 : vector<1x32xf32> to vector<32x32xf32>
    %24 = arith.mulf %22, %23 : vector<32x32xf32>
    %25 = vector.broadcast %2 : vector<1x32xf32> to vector<32x32xf32>
    %26 = arith.addf %24, %25 : vector<32x32xf32>
    %c0_9 = arith.constant 0 : index
    %c0_10 = arith.constant 0 : index
    %27 = vector.load %arg3[%c0_9, %c0_10] : memref<32x32xf32, #tpu.memory_space<vmem>>, vector<32x32xf32>
    %cst_11 = arith.constant dense<0.000000e+00> : vector<32x32xf32>
    %28 = tpu.matmul %26, %27, %cst_11 {dimension_numbers = #tpu.dot_dimension_numbers<[1], [0], [0], [1], [0, 0, 1, 1], [], []>} : vector<32x32xf32>, vector<32x32xf32>, vector<32x32xf32> -> vector<32x32xf32>
    %c2 = arith.constant 2 : index
    %c0_12 = arith.constant 0 : index
    %29 = vector.load %arg2[%c2, %c0_12] : memref<13x384xf32, #tpu.memory_space<vmem>>, vector<1x32xf32>
    %30 = vector.broadcast %29 : vector<1x32xf32> to vector<32x32xf32>
    %31 = arith.addf %28, %30 : vector<32x32xf32>
    %cst_13 = arith.constant 0.000000e+00 : f32
    %32 = vector.broadcast %cst_13 : f32 to vector<32x32xf32>
    %33 = arith.maximumf %31, %32 : vector<32x32xf32>
    %c3 = arith.constant 3 : index
    %c0_14 = arith.constant 0 : index
    %34 = vector.load %arg2[%c3, %c0_14] : memref<13x384xf32, #tpu.memory_space<vmem>>, vector<1x32xf32>
    %c4 = arith.constant 4 : index
    %c0_15 = arith.constant 0 : index
    %35 = vector.load %arg2[%c4, %c0_15] : memref<13x384xf32, #tpu.memory_space<vmem>>, vector<1x32xf32>
    %cst_16 = arith.constant dense<0.000000e+00> : vector<32xf32>
    %36 = vector.multi_reduction <add>, %33, %cst_16 [1] : vector<32x32xf32> to vector<32xf32>
    %37 = vector.shape_cast %36 : vector<32xf32> to vector<32x1xf32>
    %cst_17 = arith.constant 3.200000e+01 : f32
    %38 = vector.broadcast %cst_17 : f32 to vector<32x1xf32>
    %39 = arith.divf %37, %38 : vector<32x1xf32>
    %40 = arith.mulf %33, %33 : vector<32x32xf32>
    %cst_18 = arith.constant dense<0.000000e+00> : vector<32xf32>
    %41 = vector.multi_reduction <add>, %40, %cst_18 [1] : vector<32x32xf32> to vector<32xf32>
    %42 = vector.shape_cast %41 : vector<32xf32> to vector<32x1xf32>
    %cst_19 = arith.constant 3.200000e+01 : f32
    %43 = vector.broadcast %cst_19 : f32 to vector<32x1xf32>
    %44 = arith.divf %42, %43 : vector<32x1xf32>
    %45 = arith.mulf %39, %39 : vector<32x1xf32>
    %46 = arith.subf %44, %45 : vector<32x1xf32>
    %cst_20 = arith.constant 0.000000e+00 : f32
    %47 = vector.broadcast %cst_20 : f32 to vector<32x1xf32>
    %48 = arith.maximumf %46, %47 : vector<32x1xf32>
    %49 = vector.broadcast %39 : vector<32x1xf32> to vector<32x32xf32>
    %50 = arith.subf %33, %49 : vector<32x32xf32>
    %cst_21 = arith.constant 9.99999974E-6 : f32
    %51 = vector.broadcast %cst_21 : f32 to vector<32x1xf32>
    %52 = arith.addf %48, %51 : vector<32x1xf32>
    %53 = math.rsqrt %52 : vector<32x1xf32>
    %54 = vector.broadcast %53 : vector<32x1xf32> to vector<32x32xf32>
    %55 = arith.mulf %50, %54 : vector<32x32xf32>
    %56 = vector.broadcast %34 : vector<1x32xf32> to vector<32x32xf32>
    %57 = arith.mulf %55, %56 : vector<32x32xf32>
    %58 = vector.broadcast %35 : vector<1x32xf32> to vector<32x32xf32>
    %59 = arith.addf %57, %58 : vector<32x32xf32>
    %c0_22 = arith.constant 0 : index
    %c0_23 = arith.constant 0 : index
    %60 = vector.load %arg4[%c0_22, %c0_23] : memref<32x32xf32, #tpu.memory_space<vmem>>, vector<32x32xf32>
    %cst_24 = arith.constant dense<0.000000e+00> : vector<32x32xf32>
    %61 = tpu.matmul %59, %60, %cst_24 {dimension_numbers = #tpu.dot_dimension_numbers<[1], [0], [0], [1], [0, 0, 1, 1], [], []>} : vector<32x32xf32>, vector<32x32xf32>, vector<32x32xf32> -> vector<32x32xf32>
    %c5 = arith.constant 5 : index
    %c0_25 = arith.constant 0 : index
    %62 = vector.load %arg2[%c5, %c0_25] : memref<13x384xf32, #tpu.memory_space<vmem>>, vector<1x32xf32>
    %63 = vector.broadcast %62 : vector<1x32xf32> to vector<32x32xf32>
    %64 = arith.addf %61, %63 : vector<32x32xf32>
    %cst_26 = arith.constant 0.000000e+00 : f32
    %65 = vector.broadcast %cst_26 : f32 to vector<32x32xf32>
    %66 = arith.maximumf %64, %65 : vector<32x32xf32>
    %c6 = arith.constant 6 : index
    %c0_27 = arith.constant 0 : index
    %67 = vector.load %arg2[%c6, %c0_27] : memref<13x384xf32, #tpu.memory_space<vmem>>, vector<1x32xf32>
    %c7 = arith.constant 7 : index
    %c0_28 = arith.constant 0 : index
    %68 = vector.load %arg2[%c7, %c0_28] : memref<13x384xf32, #tpu.memory_space<vmem>>, vector<1x32xf32>
    %cst_29 = arith.constant dense<0.000000e+00> : vector<32xf32>
    %69 = vector.multi_reduction <add>, %66, %cst_29 [1] : vector<32x32xf32> to vector<32xf32>
    %70 = vector.shape_cast %69 : vector<32xf32> to vector<32x1xf32>
    %cst_30 = arith.constant 3.200000e+01 : f32
    %71 = vector.broadcast %cst_30 : f32 to vector<32x1xf32>
    %72 = arith.divf %70, %71 : vector<32x1xf32>
    %73 = arith.mulf %66, %66 : vector<32x32xf32>
    %cst_31 = arith.constant dense<0.000000e+00> : vector<32xf32>
    %74 = vector.multi_reduction <add>, %73, %cst_31 [1] : vector<32x32xf32> to vector<32xf32>
    %75 = vector.shape_cast %74 : vector<32xf32> to vector<32x1xf32>
    %cst_32 = arith.constant 3.200000e+01 : f32
    %76 = vector.broadcast %cst_32 : f32 to vector<32x1xf32>
    %77 = arith.divf %75, %76 : vector<32x1xf32>
    %78 = arith.mulf %72, %72 : vector<32x1xf32>
    %79 = arith.subf %77, %78 : vector<32x1xf32>
    %cst_33 = arith.constant 0.000000e+00 : f32
    %80 = vector.broadcast %cst_33 : f32 to vector<32x1xf32>
    %81 = arith.maximumf %79, %80 : vector<32x1xf32>
    %82 = vector.broadcast %72 : vector<32x1xf32> to vector<32x32xf32>
    %83 = arith.subf %66, %82 : vector<32x32xf32>
    %cst_34 = arith.constant 9.99999974E-6 : f32
    %84 = vector.broadcast %cst_34 : f32 to vector<32x1xf32>
    %85 = arith.addf %81, %84 : vector<32x1xf32>
    %86 = math.rsqrt %85 : vector<32x1xf32>
    %87 = vector.broadcast %86 : vector<32x1xf32> to vector<32x32xf32>
    %88 = arith.mulf %83, %87 : vector<32x32xf32>
    %89 = vector.broadcast %67 : vector<1x32xf32> to vector<32x32xf32>
    %90 = arith.mulf %88, %89 : vector<32x32xf32>
    %91 = vector.broadcast %68 : vector<1x32xf32> to vector<32x32xf32>
    %92 = arith.addf %90, %91 : vector<32x32xf32>
    %c0_35 = arith.constant 0 : index
    %c0_36 = arith.constant 0 : index
    %93 = vector.load %arg5[%c0_35, %c0_36] : memref<32x384xf32, #tpu.memory_space<vmem>>, vector<32x384xf32>
    %cst_37 = arith.constant dense<0.000000e+00> : vector<32x384xf32>
    %94 = tpu.matmul %92, %93, %cst_37 {dimension_numbers = #tpu.dot_dimension_numbers<[1], [0], [0], [1], [0, 0, 1, 1], [], []>} : vector<32x32xf32>, vector<32x384xf32>, vector<32x384xf32> -> vector<32x384xf32>
    %c11 = arith.constant 11 : index
    %c0_38 = arith.constant 0 : index
    %95 = vector.load %arg2[%c11, %c0_38] : memref<13x384xf32, #tpu.memory_space<vmem>>, vector<1x384xf32>
    %96 = vector.broadcast %95 : vector<1x384xf32> to vector<32x384xf32>
    %97 = arith.addf %94, %96 : vector<32x384xf32>
    %c0_39 = arith.constant 0 : index
    %c0_40 = arith.constant 0 : index
    %98 = vector.load %arg6[%c0_39, %c0_40] : memref<32x384xf32, #tpu.memory_space<vmem>>, vector<32x384xf32>
    %c12 = arith.constant 12 : index
    %c0_41 = arith.constant 0 : index
    %99 = vector.load %arg2[%c12, %c0_41] : memref<13x384xf32, #tpu.memory_space<vmem>>, vector<1x32xf32>
    %100 = vector.shape_cast %99 : vector<1x32xf32> to vector<1x32xf32>
    %101 = vector.broadcast %100 : vector<1x32xf32> to vector<4x32xf32>
    %c0_42 = arith.constant 0 : index
    %c0_43 = arith.constant 0 : index
    %102 = vector.load %arg1[%c0_42, %c0_43] : memref<4x32xf32, #tpu.memory_space<vmem>>, vector<4x32xf32>
    %cst_44 = arith.constant dense<0.000000e+00> : vector<4x384xf32>
    %103 = tpu.matmul %102, %98, %cst_44 {dimension_numbers = #tpu.dot_dimension_numbers<[1], [0], [0], [1], [0, 0, 1, 1], [], []>} : vector<4x32xf32>, vector<32x384xf32>, vector<4x384xf32> -> vector<4x384xf32>
    %104 = vector.extract_strided_slice %97 {offsets = [0, 0], sizes = [4, 32], strides = [1, 1]} : vector<32x384xf32> to vector<4x32xf32>
    %105 = vector.extract_strided_slice %103 {offsets = [0, 0], sizes = [4, 32], strides = [1, 1]} : vector<4x384xf32> to vector<4x32xf32>
    %106 = arith.addf %104, %105 : vector<4x32xf32>
    %107 = arith.negf %106 : vector<4x32xf32>
    %108 = math.exp %107 : vector<4x32xf32>
    %cst_45 = arith.constant 1.000000e+00 : f32
    %109 = vector.broadcast %cst_45 : f32 to vector<4x32xf32>
    %110 = arith.addf %109, %108 : vector<4x32xf32>
    %111 = arith.divf %109, %110 : vector<4x32xf32>
    %112 = vector.extract_strided_slice %97 {offsets = [0, 128], sizes = [4, 32], strides = [1, 1]} : vector<32x384xf32> to vector<4x32xf32>
    %113 = vector.extract_strided_slice %103 {offsets = [0, 128], sizes = [4, 32], strides = [1, 1]} : vector<4x384xf32> to vector<4x32xf32>
    %114 = arith.addf %112, %113 : vector<4x32xf32>
    %115 = arith.negf %114 : vector<4x32xf32>
    %116 = math.exp %115 : vector<4x32xf32>
    %cst_46 = arith.constant 1.000000e+00 : f32
    %117 = vector.broadcast %cst_46 : f32 to vector<4x32xf32>
    %118 = arith.addf %117, %116 : vector<4x32xf32>
    %119 = arith.divf %117, %118 : vector<4x32xf32>
    %120 = vector.extract_strided_slice %97 {offsets = [0, 256], sizes = [4, 32], strides = [1, 1]} : vector<32x384xf32> to vector<4x32xf32>
    %121 = vector.extract_strided_slice %103 {offsets = [0, 256], sizes = [4, 32], strides = [1, 1]} : vector<4x384xf32> to vector<4x32xf32>
    %122 = arith.addf %121, %101 : vector<4x32xf32>
    %123 = arith.mulf %111, %122 : vector<4x32xf32>
    %124 = arith.addf %120, %123 : vector<4x32xf32>
    %125 = math.tanh %124 : vector<4x32xf32>
    %cst_47 = arith.constant 1.000000e+00 : f32
    %126 = vector.broadcast %cst_47 : f32 to vector<4x32xf32>
    %127 = arith.subf %126, %119 : vector<4x32xf32>
    %128 = arith.mulf %127, %125 : vector<4x32xf32>
    %129 = arith.mulf %119, %102 : vector<4x32xf32>
    %130 = arith.addf %128, %129 : vector<4x32xf32>
    %cst_48 = arith.constant dense<0.000000e+00> : vector<4x384xf32>
    %131 = tpu.matmul %130, %98, %cst_48 {dimension_numbers = #tpu.dot_dimension_numbers<[1], [0], [0], [1], [0, 0, 1, 1], [], []>} : vector<4x32xf32>, vector<32x384xf32>, vector<4x384xf32> -> vector<4x384xf32>
    %132 = vector.extract_strided_slice %97 {offsets = [4, 0], sizes = [4, 32], strides = [1, 1]} : vector<32x384xf32> to vector<4x32xf32>
    %133 = vector.extract_strided_slice %131 {offsets = [0, 0], sizes = [4, 32], strides = [1, 1]} : vector<4x384xf32> to vector<4x32xf32>
    %134 = arith.addf %132, %133 : vector<4x32xf32>
    %135 = arith.negf %134 : vector<4x32xf32>
    %136 = math.exp %135 : vector<4x32xf32>
    %cst_49 = arith.constant 1.000000e+00 : f32
    %137 = vector.broadcast %cst_49 : f32 to vector<4x32xf32>
    %138 = arith.addf %137, %136 : vector<4x32xf32>
    %139 = arith.divf %137, %138 : vector<4x32xf32>
    %140 = vector.extract_strided_slice %97 {offsets = [4, 128], sizes = [4, 32], strides = [1, 1]} : vector<32x384xf32> to vector<4x32xf32>
    %141 = vector.extract_strided_slice %131 {offsets = [0, 128], sizes = [4, 32], strides = [1, 1]} : vector<4x384xf32> to vector<4x32xf32>
    %142 = arith.addf %140, %141 : vector<4x32xf32>
    %143 = arith.negf %142 : vector<4x32xf32>
    %144 = math.exp %143 : vector<4x32xf32>
    %cst_50 = arith.constant 1.000000e+00 : f32
    %145 = vector.broadcast %cst_50 : f32 to vector<4x32xf32>
    %146 = arith.addf %145, %144 : vector<4x32xf32>
    %147 = arith.divf %145, %146 : vector<4x32xf32>
    %148 = vector.extract_strided_slice %97 {offsets = [4, 256], sizes = [4, 32], strides = [1, 1]} : vector<32x384xf32> to vector<4x32xf32>
    %149 = vector.extract_strided_slice %131 {offsets = [0, 256], sizes = [4, 32], strides = [1, 1]} : vector<4x384xf32> to vector<4x32xf32>
    %150 = arith.addf %149, %101 : vector<4x32xf32>
    %151 = arith.mulf %139, %150 : vector<4x32xf32>
    %152 = arith.addf %148, %151 : vector<4x32xf32>
    %153 = math.tanh %152 : vector<4x32xf32>
    %cst_51 = arith.constant 1.000000e+00 : f32
    %154 = vector.broadcast %cst_51 : f32 to vector<4x32xf32>
    %155 = arith.subf %154, %147 : vector<4x32xf32>
    %156 = arith.mulf %155, %153 : vector<4x32xf32>
    %157 = arith.mulf %147, %130 : vector<4x32xf32>
    %158 = arith.addf %156, %157 : vector<4x32xf32>
    %cst_52 = arith.constant dense<0.000000e+00> : vector<4x384xf32>
    %159 = tpu.matmul %158, %98, %cst_52 {dimension_numbers = #tpu.dot_dimension_numbers<[1], [0], [0], [1], [0, 0, 1, 1], [], []>} : vector<4x32xf32>, vector<32x384xf32>, vector<4x384xf32> -> vector<4x384xf32>
    %160 = vector.extract_strided_slice %97 {offsets = [8, 0], sizes = [4, 32], strides = [1, 1]} : vector<32x384xf32> to vector<4x32xf32>
    %161 = vector.extract_strided_slice %159 {offsets = [0, 0], sizes = [4, 32], strides = [1, 1]} : vector<4x384xf32> to vector<4x32xf32>
    %162 = arith.addf %160, %161 : vector<4x32xf32>
    %163 = arith.negf %162 : vector<4x32xf32>
    %164 = math.exp %163 : vector<4x32xf32>
    %cst_53 = arith.constant 1.000000e+00 : f32
    %165 = vector.broadcast %cst_53 : f32 to vector<4x32xf32>
    %166 = arith.addf %165, %164 : vector<4x32xf32>
    %167 = arith.divf %165, %166 : vector<4x32xf32>
    %168 = vector.extract_strided_slice %97 {offsets = [8, 128], sizes = [4, 32], strides = [1, 1]} : vector<32x384xf32> to vector<4x32xf32>
    %169 = vector.extract_strided_slice %159 {offsets = [0, 128], sizes = [4, 32], strides = [1, 1]} : vector<4x384xf32> to vector<4x32xf32>
    %170 = arith.addf %168, %169 : vector<4x32xf32>
    %171 = arith.negf %170 : vector<4x32xf32>
    %172 = math.exp %171 : vector<4x32xf32>
    %cst_54 = arith.constant 1.000000e+00 : f32
    %173 = vector.broadcast %cst_54 : f32 to vector<4x32xf32>
    %174 = arith.addf %173, %172 : vector<4x32xf32>
    %175 = arith.divf %173, %174 : vector<4x32xf32>
    %176 = vector.extract_strided_slice %97 {offsets = [8, 256], sizes = [4, 32], strides = [1, 1]} : vector<32x384xf32> to vector<4x32xf32>
    %177 = vector.extract_strided_slice %159 {offsets = [0, 256], sizes = [4, 32], strides = [1, 1]} : vector<4x384xf32> to vector<4x32xf32>
    %178 = arith.addf %177, %101 : vector<4x32xf32>
    %179 = arith.mulf %167, %178 : vector<4x32xf32>
    %180 = arith.addf %176, %179 : vector<4x32xf32>
    %181 = math.tanh %180 : vector<4x32xf32>
    %cst_55 = arith.constant 1.000000e+00 : f32
    %182 = vector.broadcast %cst_55 : f32 to vector<4x32xf32>
    %183 = arith.subf %182, %175 : vector<4x32xf32>
    %184 = arith.mulf %183, %181 : vector<4x32xf32>
    %185 = arith.mulf %175, %158 : vector<4x32xf32>
    %186 = arith.addf %184, %185 : vector<4x32xf32>
    %cst_56 = arith.constant dense<0.000000e+00> : vector<4x384xf32>
    %187 = tpu.matmul %186, %98, %cst_56 {dimension_numbers = #tpu.dot_dimension_numbers<[1], [0], [0], [1], [0, 0, 1, 1], [], []>} : vector<4x32xf32>, vector<32x384xf32>, vector<4x384xf32> -> vector<4x384xf32>
    %188 = vector.extract_strided_slice %97 {offsets = [12, 0], sizes = [4, 32], strides = [1, 1]} : vector<32x384xf32> to vector<4x32xf32>
    %189 = vector.extract_strided_slice %187 {offsets = [0, 0], sizes = [4, 32], strides = [1, 1]} : vector<4x384xf32> to vector<4x32xf32>
    %190 = arith.addf %188, %189 : vector<4x32xf32>
    %191 = arith.negf %190 : vector<4x32xf32>
    %192 = math.exp %191 : vector<4x32xf32>
    %cst_57 = arith.constant 1.000000e+00 : f32
    %193 = vector.broadcast %cst_57 : f32 to vector<4x32xf32>
    %194 = arith.addf %193, %192 : vector<4x32xf32>
    %195 = arith.divf %193, %194 : vector<4x32xf32>
    %196 = vector.extract_strided_slice %97 {offsets = [12, 128], sizes = [4, 32], strides = [1, 1]} : vector<32x384xf32> to vector<4x32xf32>
    %197 = vector.extract_strided_slice %187 {offsets = [0, 128], sizes = [4, 32], strides = [1, 1]} : vector<4x384xf32> to vector<4x32xf32>
    %198 = arith.addf %196, %197 : vector<4x32xf32>
    %199 = arith.negf %198 : vector<4x32xf32>
    %200 = math.exp %199 : vector<4x32xf32>
    %cst_58 = arith.constant 1.000000e+00 : f32
    %201 = vector.broadcast %cst_58 : f32 to vector<4x32xf32>
    %202 = arith.addf %201, %200 : vector<4x32xf32>
    %203 = arith.divf %201, %202 : vector<4x32xf32>
    %204 = vector.extract_strided_slice %97 {offsets = [12, 256], sizes = [4, 32], strides = [1, 1]} : vector<32x384xf32> to vector<4x32xf32>
    %205 = vector.extract_strided_slice %187 {offsets = [0, 256], sizes = [4, 32], strides = [1, 1]} : vector<4x384xf32> to vector<4x32xf32>
    %206 = arith.addf %205, %101 : vector<4x32xf32>
    %207 = arith.mulf %195, %206 : vector<4x32xf32>
    %208 = arith.addf %204, %207 : vector<4x32xf32>
    %209 = math.tanh %208 : vector<4x32xf32>
    %cst_59 = arith.constant 1.000000e+00 : f32
    %210 = vector.broadcast %cst_59 : f32 to vector<4x32xf32>
    %211 = arith.subf %210, %203 : vector<4x32xf32>
    %212 = arith.mulf %211, %209 : vector<4x32xf32>
    %213 = arith.mulf %203, %186 : vector<4x32xf32>
    %214 = arith.addf %212, %213 : vector<4x32xf32>
    %cst_60 = arith.constant dense<0.000000e+00> : vector<4x384xf32>
    %215 = tpu.matmul %214, %98, %cst_60 {dimension_numbers = #tpu.dot_dimension_numbers<[1], [0], [0], [1], [0, 0, 1, 1], [], []>} : vector<4x32xf32>, vector<32x384xf32>, vector<4x384xf32> -> vector<4x384xf32>
    %216 = vector.extract_strided_slice %97 {offsets = [16, 0], sizes = [4, 32], strides = [1, 1]} : vector<32x384xf32> to vector<4x32xf32>
    %217 = vector.extract_strided_slice %215 {offsets = [0, 0], sizes = [4, 32], strides = [1, 1]} : vector<4x384xf32> to vector<4x32xf32>
    %218 = arith.addf %216, %217 : vector<4x32xf32>
    %219 = arith.negf %218 : vector<4x32xf32>
    %220 = math.exp %219 : vector<4x32xf32>
    %cst_61 = arith.constant 1.000000e+00 : f32
    %221 = vector.broadcast %cst_61 : f32 to vector<4x32xf32>
    %222 = arith.addf %221, %220 : vector<4x32xf32>
    %223 = arith.divf %221, %222 : vector<4x32xf32>
    %224 = vector.extract_strided_slice %97 {offsets = [16, 128], sizes = [4, 32], strides = [1, 1]} : vector<32x384xf32> to vector<4x32xf32>
    %225 = vector.extract_strided_slice %215 {offsets = [0, 128], sizes = [4, 32], strides = [1, 1]} : vector<4x384xf32> to vector<4x32xf32>
    %226 = arith.addf %224, %225 : vector<4x32xf32>
    %227 = arith.negf %226 : vector<4x32xf32>
    %228 = math.exp %227 : vector<4x32xf32>
    %cst_62 = arith.constant 1.000000e+00 : f32
    %229 = vector.broadcast %cst_62 : f32 to vector<4x32xf32>
    %230 = arith.addf %229, %228 : vector<4x32xf32>
    %231 = arith.divf %229, %230 : vector<4x32xf32>
    %232 = vector.extract_strided_slice %97 {offsets = [16, 256], sizes = [4, 32], strides = [1, 1]} : vector<32x384xf32> to vector<4x32xf32>
    %233 = vector.extract_strided_slice %215 {offsets = [0, 256], sizes = [4, 32], strides = [1, 1]} : vector<4x384xf32> to vector<4x32xf32>
    %234 = arith.addf %233, %101 : vector<4x32xf32>
    %235 = arith.mulf %223, %234 : vector<4x32xf32>
    %236 = arith.addf %232, %235 : vector<4x32xf32>
    %237 = math.tanh %236 : vector<4x32xf32>
    %cst_63 = arith.constant 1.000000e+00 : f32
    %238 = vector.broadcast %cst_63 : f32 to vector<4x32xf32>
    %239 = arith.subf %238, %231 : vector<4x32xf32>
    %240 = arith.mulf %239, %237 : vector<4x32xf32>
    %241 = arith.mulf %231, %214 : vector<4x32xf32>
    %242 = arith.addf %240, %241 : vector<4x32xf32>
    %cst_64 = arith.constant dense<0.000000e+00> : vector<4x384xf32>
    %243 = tpu.matmul %242, %98, %cst_64 {dimension_numbers = #tpu.dot_dimension_numbers<[1], [0], [0], [1], [0, 0, 1, 1], [], []>} : vector<4x32xf32>, vector<32x384xf32>, vector<4x384xf32> -> vector<4x384xf32>
    %244 = vector.extract_strided_slice %97 {offsets = [20, 0], sizes = [4, 32], strides = [1, 1]} : vector<32x384xf32> to vector<4x32xf32>
    %245 = vector.extract_strided_slice %243 {offsets = [0, 0], sizes = [4, 32], strides = [1, 1]} : vector<4x384xf32> to vector<4x32xf32>
    %246 = arith.addf %244, %245 : vector<4x32xf32>
    %247 = arith.negf %246 : vector<4x32xf32>
    %248 = math.exp %247 : vector<4x32xf32>
    %cst_65 = arith.constant 1.000000e+00 : f32
    %249 = vector.broadcast %cst_65 : f32 to vector<4x32xf32>
    %250 = arith.addf %249, %248 : vector<4x32xf32>
    %251 = arith.divf %249, %250 : vector<4x32xf32>
    %252 = vector.extract_strided_slice %97 {offsets = [20, 128], sizes = [4, 32], strides = [1, 1]} : vector<32x384xf32> to vector<4x32xf32>
    %253 = vector.extract_strided_slice %243 {offsets = [0, 128], sizes = [4, 32], strides = [1, 1]} : vector<4x384xf32> to vector<4x32xf32>
    %254 = arith.addf %252, %253 : vector<4x32xf32>
    %255 = arith.negf %254 : vector<4x32xf32>
    %256 = math.exp %255 : vector<4x32xf32>
    %cst_66 = arith.constant 1.000000e+00 : f32
    %257 = vector.broadcast %cst_66 : f32 to vector<4x32xf32>
    %258 = arith.addf %257, %256 : vector<4x32xf32>
    %259 = arith.divf %257, %258 : vector<4x32xf32>
    %260 = vector.extract_strided_slice %97 {offsets = [20, 256], sizes = [4, 32], strides = [1, 1]} : vector<32x384xf32> to vector<4x32xf32>
    %261 = vector.extract_strided_slice %243 {offsets = [0, 256], sizes = [4, 32], strides = [1, 1]} : vector<4x384xf32> to vector<4x32xf32>
    %262 = arith.addf %261, %101 : vector<4x32xf32>
    %263 = arith.mulf %251, %262 : vector<4x32xf32>
    %264 = arith.addf %260, %263 : vector<4x32xf32>
    %265 = math.tanh %264 : vector<4x32xf32>
    %cst_67 = arith.constant 1.000000e+00 : f32
    %266 = vector.broadcast %cst_67 : f32 to vector<4x32xf32>
    %267 = arith.subf %266, %259 : vector<4x32xf32>
    %268 = arith.mulf %267, %265 : vector<4x32xf32>
    %269 = arith.mulf %259, %242 : vector<4x32xf32>
    %270 = arith.addf %268, %269 : vector<4x32xf32>
    %cst_68 = arith.constant dense<0.000000e+00> : vector<4x384xf32>
    %271 = tpu.matmul %270, %98, %cst_68 {dimension_numbers = #tpu.dot_dimension_numbers<[1], [0], [0], [1], [0, 0, 1, 1], [], []>} : vector<4x32xf32>, vector<32x384xf32>, vector<4x384xf32> -> vector<4x384xf32>
    %272 = vector.extract_strided_slice %97 {offsets = [24, 0], sizes = [4, 32], strides = [1, 1]} : vector<32x384xf32> to vector<4x32xf32>
    %273 = vector.extract_strided_slice %271 {offsets = [0, 0], sizes = [4, 32], strides = [1, 1]} : vector<4x384xf32> to vector<4x32xf32>
    %274 = arith.addf %272, %273 : vector<4x32xf32>
    %275 = arith.negf %274 : vector<4x32xf32>
    %276 = math.exp %275 : vector<4x32xf32>
    %cst_69 = arith.constant 1.000000e+00 : f32
    %277 = vector.broadcast %cst_69 : f32 to vector<4x32xf32>
    %278 = arith.addf %277, %276 : vector<4x32xf32>
    %279 = arith.divf %277, %278 : vector<4x32xf32>
    %280 = vector.extract_strided_slice %97 {offsets = [24, 128], sizes = [4, 32], strides = [1, 1]} : vector<32x384xf32> to vector<4x32xf32>
    %281 = vector.extract_strided_slice %271 {offsets = [0, 128], sizes = [4, 32], strides = [1, 1]} : vector<4x384xf32> to vector<4x32xf32>
    %282 = arith.addf %280, %281 : vector<4x32xf32>
    %283 = arith.negf %282 : vector<4x32xf32>
    %284 = math.exp %283 : vector<4x32xf32>
    %cst_70 = arith.constant 1.000000e+00 : f32
    %285 = vector.broadcast %cst_70 : f32 to vector<4x32xf32>
    %286 = arith.addf %285, %284 : vector<4x32xf32>
    %287 = arith.divf %285, %286 : vector<4x32xf32>
    %288 = vector.extract_strided_slice %97 {offsets = [24, 256], sizes = [4, 32], strides = [1, 1]} : vector<32x384xf32> to vector<4x32xf32>
    %289 = vector.extract_strided_slice %271 {offsets = [0, 256], sizes = [4, 32], strides = [1, 1]} : vector<4x384xf32> to vector<4x32xf32>
    %290 = arith.addf %289, %101 : vector<4x32xf32>
    %291 = arith.mulf %279, %290 : vector<4x32xf32>
    %292 = arith.addf %288, %291 : vector<4x32xf32>
    %293 = math.tanh %292 : vector<4x32xf32>
    %cst_71 = arith.constant 1.000000e+00 : f32
    %294 = vector.broadcast %cst_71 : f32 to vector<4x32xf32>
    %295 = arith.subf %294, %287 : vector<4x32xf32>
    %296 = arith.mulf %295, %293 : vector<4x32xf32>
    %297 = arith.mulf %287, %270 : vector<4x32xf32>
    %298 = arith.addf %296, %297 : vector<4x32xf32>
    %cst_72 = arith.constant dense<0.000000e+00> : vector<4x384xf32>
    %299 = tpu.matmul %298, %98, %cst_72 {dimension_numbers = #tpu.dot_dimension_numbers<[1], [0], [0], [1], [0, 0, 1, 1], [], []>} : vector<4x32xf32>, vector<32x384xf32>, vector<4x384xf32> -> vector<4x384xf32>
    %300 = vector.extract_strided_slice %97 {offsets = [28, 0], sizes = [4, 32], strides = [1, 1]} : vector<32x384xf32> to vector<4x32xf32>
    %301 = vector.extract_strided_slice %299 {offsets = [0, 0], sizes = [4, 32], strides = [1, 1]} : vector<4x384xf32> to vector<4x32xf32>
    %302 = arith.addf %300, %301 : vector<4x32xf32>
    %303 = arith.negf %302 : vector<4x32xf32>
    %304 = math.exp %303 : vector<4x32xf32>
    %cst_73 = arith.constant 1.000000e+00 : f32
    %305 = vector.broadcast %cst_73 : f32 to vector<4x32xf32>
    %306 = arith.addf %305, %304 : vector<4x32xf32>
    %307 = arith.divf %305, %306 : vector<4x32xf32>
    %308 = vector.extract_strided_slice %97 {offsets = [28, 128], sizes = [4, 32], strides = [1, 1]} : vector<32x384xf32> to vector<4x32xf32>
    %309 = vector.extract_strided_slice %299 {offsets = [0, 128], sizes = [4, 32], strides = [1, 1]} : vector<4x384xf32> to vector<4x32xf32>
    %310 = arith.addf %308, %309 : vector<4x32xf32>
    %311 = arith.negf %310 : vector<4x32xf32>
    %312 = math.exp %311 : vector<4x32xf32>
    %cst_74 = arith.constant 1.000000e+00 : f32
    %313 = vector.broadcast %cst_74 : f32 to vector<4x32xf32>
    %314 = arith.addf %313, %312 : vector<4x32xf32>
    %315 = arith.divf %313, %314 : vector<4x32xf32>
    %316 = vector.extract_strided_slice %97 {offsets = [28, 256], sizes = [4, 32], strides = [1, 1]} : vector<32x384xf32> to vector<4x32xf32>
    %317 = vector.extract_strided_slice %299 {offsets = [0, 256], sizes = [4, 32], strides = [1, 1]} : vector<4x384xf32> to vector<4x32xf32>
    %318 = arith.addf %317, %101 : vector<4x32xf32>
    %319 = arith.mulf %307, %318 : vector<4x32xf32>
    %320 = arith.addf %316, %319 : vector<4x32xf32>
    %321 = math.tanh %320 : vector<4x32xf32>
    %cst_75 = arith.constant 1.000000e+00 : f32
    %322 = vector.broadcast %cst_75 : f32 to vector<4x32xf32>
    %323 = arith.subf %322, %315 : vector<4x32xf32>
    %324 = arith.mulf %323, %321 : vector<4x32xf32>
    %325 = arith.mulf %315, %298 : vector<4x32xf32>
    %326 = arith.addf %324, %325 : vector<4x32xf32>
    %c0_76 = arith.constant 0 : index
    %c0_77 = arith.constant 0 : index
    %327 = vector.load %arg9[%c0_76, %c0_77] : memref<4x32xf32, #tpu.memory_space<vmem>>, vector<4x32xf32>
    tpu.vector_store %arg9[%c0_76, %c0_77], %326 {strides = array<i32>} : memref<4x32xf32, #tpu.memory_space<vmem>>, vector<4x32xf32>,
    %c8 = arith.constant 8 : index
    %c0_78 = arith.constant 0 : index
    %328 = vector.load %arg2[%c8, %c0_78] : memref<13x384xf32, #tpu.memory_space<vmem>>, vector<1x32xf32>
    %329 = vector.shape_cast %328 : vector<1x32xf32> to vector<1x32xf32>
    %330 = vector.broadcast %329 : vector<1x32xf32> to vector<4x32xf32>
    %c9 = arith.constant 9 : index
    %c0_79 = arith.constant 0 : index
    %331 = vector.load %arg2[%c9, %c0_79] : memref<13x384xf32, #tpu.memory_space<vmem>>, vector<1x32xf32>
    %332 = vector.shape_cast %331 : vector<1x32xf32> to vector<1x32xf32>
    %333 = vector.broadcast %332 : vector<1x32xf32> to vector<4x32xf32>
    %c10 = arith.constant 10 : index
    %c0_80 = arith.constant 0 : index
    %334 = vector.load %arg2[%c10, %c0_80] : memref<13x384xf32, #tpu.memory_space<vmem>>, vector<1x2xf32>
    %335 = vector.shape_cast %334 : vector<1x2xf32> to vector<1x2xf32>
    %336 = vector.broadcast %335 : vector<1x2xf32> to vector<4x2xf32>
    %c0_81 = arith.constant 0 : index
    %c0_82 = arith.constant 0 : index
    %337 = vector.load %arg7[%c0_81, %c0_82] : memref<32x2xf32, #tpu.memory_space<vmem>>, vector<32x2xf32>
    %cst_83 = arith.constant dense<0.000000e+00> : vector<4xf32>
    %338 = vector.multi_reduction <add>, %130, %cst_83 [1] : vector<4x32xf32> to vector<4xf32>
    %339 = vector.shape_cast %338 : vector<4xf32> to vector<4x1xf32>
    %cst_84 = arith.constant 3.200000e+01 : f32
    %340 = vector.broadcast %cst_84 : f32 to vector<4x1xf32>
    %341 = arith.divf %339, %340 : vector<4x1xf32>
    %342 = arith.mulf %130, %130 : vector<4x32xf32>
    %cst_85 = arith.constant dense<0.000000e+00> : vector<4xf32>
    %343 = vector.multi_reduction <add>, %342, %cst_85 [1] : vector<4x32xf32> to vector<4xf32>
    %344 = vector.shape_cast %343 : vector<4xf32> to vector<4x1xf32>
    %cst_86 = arith.constant 3.200000e+01 : f32
    %345 = vector.broadcast %cst_86 : f32 to vector<4x1xf32>
    %346 = arith.divf %344, %345 : vector<4x1xf32>
    %347 = arith.mulf %341, %341 : vector<4x1xf32>
    %348 = arith.subf %346, %347 : vector<4x1xf32>
    %cst_87 = arith.constant 0.000000e+00 : f32
    %349 = vector.broadcast %cst_87 : f32 to vector<4x1xf32>
    %350 = arith.maximumf %348, %349 : vector<4x1xf32>
    %351 = vector.broadcast %341 : vector<4x1xf32> to vector<4x32xf32>
    %352 = arith.subf %130, %351 : vector<4x32xf32>
    %cst_88 = arith.constant 9.99999974E-6 : f32
    %353 = vector.broadcast %cst_88 : f32 to vector<4x1xf32>
    %354 = arith.addf %350, %353 : vector<4x1xf32>
    %355 = math.rsqrt %354 : vector<4x1xf32>
    %356 = vector.broadcast %355 : vector<4x1xf32> to vector<4x32xf32>
    %357 = arith.mulf %352, %356 : vector<4x32xf32>
    %358 = arith.mulf %357, %330 : vector<4x32xf32>
    %359 = arith.addf %358, %333 : vector<4x32xf32>
    %cst_89 = arith.constant dense<0.000000e+00> : vector<4x2xf32>
    %360 = tpu.matmul %359, %337, %cst_89 {dimension_numbers = #tpu.dot_dimension_numbers<[1], [0], [0], [1], [0, 0, 1, 1], [], []>} : vector<4x32xf32>, vector<32x2xf32>, vector<4x2xf32> -> vector<4x2xf32>
    %361 = arith.addf %360, %336 : vector<4x2xf32>
    %c0_90 = arith.constant 0 : index
    %c0_91 = arith.constant 0 : index
    %362 = vector.load %arg8[%c0_90, %c0_91] : memref<32x2xf32, #tpu.memory_space<vmem>>, vector<4x2xf32>
    tpu.vector_store %arg8[%c0_90, %c0_91], %361 {strides = array<i32>} : memref<32x2xf32, #tpu.memory_space<vmem>>, vector<4x2xf32>,
    %cst_92 = arith.constant dense<0.000000e+00> : vector<4xf32>
    %363 = vector.multi_reduction <add>, %158, %cst_92 [1] : vector<4x32xf32> to vector<4xf32>
    %364 = vector.shape_cast %363 : vector<4xf32> to vector<4x1xf32>
    %cst_93 = arith.constant 3.200000e+01 : f32
    %365 = vector.broadcast %cst_93 : f32 to vector<4x1xf32>
    %366 = arith.divf %364, %365 : vector<4x1xf32>
    %367 = arith.mulf %158, %158 : vector<4x32xf32>
    %cst_94 = arith.constant dense<0.000000e+00> : vector<4xf32>
    %368 = vector.multi_reduction <add>, %367, %cst_94 [1] : vector<4x32xf32> to vector<4xf32>
    %369 = vector.shape_cast %368 : vector<4xf32> to vector<4x1xf32>
    %cst_95 = arith.constant 3.200000e+01 : f32
    %370 = vector.broadcast %cst_95 : f32 to vector<4x1xf32>
    %371 = arith.divf %369, %370 : vector<4x1xf32>
    %372 = arith.mulf %366, %366 : vector<4x1xf32>
    %373 = arith.subf %371, %372 : vector<4x1xf32>
    %cst_96 = arith.constant 0.000000e+00 : f32
    %374 = vector.broadcast %cst_96 : f32 to vector<4x1xf32>
    %375 = arith.maximumf %373, %374 : vector<4x1xf32>
    %376 = vector.broadcast %366 : vector<4x1xf32> to vector<4x32xf32>
    %377 = arith.subf %158, %376 : vector<4x32xf32>
    %cst_97 = arith.constant 9.99999974E-6 : f32
    %378 = vector.broadcast %cst_97 : f32 to vector<4x1xf32>
    %379 = arith.addf %375, %378 : vector<4x1xf32>
    %380 = math.rsqrt %379 : vector<4x1xf32>
    %381 = vector.broadcast %380 : vector<4x1xf32> to vector<4x32xf32>
    %382 = arith.mulf %377, %381 : vector<4x32xf32>
    %383 = arith.mulf %382, %330 : vector<4x32xf32>
    %384 = arith.addf %383, %333 : vector<4x32xf32>
    %cst_98 = arith.constant dense<0.000000e+00> : vector<4x2xf32>
    %385 = tpu.matmul %384, %337, %cst_98 {dimension_numbers = #tpu.dot_dimension_numbers<[1], [0], [0], [1], [0, 0, 1, 1], [], []>} : vector<4x32xf32>, vector<32x2xf32>, vector<4x2xf32> -> vector<4x2xf32>
    %386 = arith.addf %385, %336 : vector<4x2xf32>
    %c4_99 = arith.constant 4 : index
    %c0_100 = arith.constant 0 : index
    %387 = vector.load %arg8[%c4_99, %c0_100] : memref<32x2xf32, #tpu.memory_space<vmem>>, vector<4x2xf32>
    tpu.vector_store %arg8[%c4_99, %c0_100], %386 {strides = array<i32>} : memref<32x2xf32, #tpu.memory_space<vmem>>, vector<4x2xf32>,
    %cst_101 = arith.constant dense<0.000000e+00> : vector<4xf32>
    %388 = vector.multi_reduction <add>, %186, %cst_101 [1] : vector<4x32xf32> to vector<4xf32>
    %389 = vector.shape_cast %388 : vector<4xf32> to vector<4x1xf32>
    %cst_102 = arith.constant 3.200000e+01 : f32
    %390 = vector.broadcast %cst_102 : f32 to vector<4x1xf32>
    %391 = arith.divf %389, %390 : vector<4x1xf32>
    %392 = arith.mulf %186, %186 : vector<4x32xf32>
    %cst_103 = arith.constant dense<0.000000e+00> : vector<4xf32>
    %393 = vector.multi_reduction <add>, %392, %cst_103 [1] : vector<4x32xf32> to vector<4xf32>
    %394 = vector.shape_cast %393 : vector<4xf32> to vector<4x1xf32>
    %cst_104 = arith.constant 3.200000e+01 : f32
    %395 = vector.broadcast %cst_104 : f32 to vector<4x1xf32>
    %396 = arith.divf %394, %395 : vector<4x1xf32>
    %397 = arith.mulf %391, %391 : vector<4x1xf32>
    %398 = arith.subf %396, %397 : vector<4x1xf32>
    %cst_105 = arith.constant 0.000000e+00 : f32
    %399 = vector.broadcast %cst_105 : f32 to vector<4x1xf32>
    %400 = arith.maximumf %398, %399 : vector<4x1xf32>
    %401 = vector.broadcast %391 : vector<4x1xf32> to vector<4x32xf32>
    %402 = arith.subf %186, %401 : vector<4x32xf32>
    %cst_106 = arith.constant 9.99999974E-6 : f32
    %403 = vector.broadcast %cst_106 : f32 to vector<4x1xf32>
    %404 = arith.addf %400, %403 : vector<4x1xf32>
    %405 = math.rsqrt %404 : vector<4x1xf32>
    %406 = vector.broadcast %405 : vector<4x1xf32> to vector<4x32xf32>
    %407 = arith.mulf %402, %406 : vector<4x32xf32>
    %408 = arith.mulf %407, %330 : vector<4x32xf32>
    %409 = arith.addf %408, %333 : vector<4x32xf32>
    %cst_107 = arith.constant dense<0.000000e+00> : vector<4x2xf32>
    %410 = tpu.matmul %409, %337, %cst_107 {dimension_numbers = #tpu.dot_dimension_numbers<[1], [0], [0], [1], [0, 0, 1, 1], [], []>} : vector<4x32xf32>, vector<32x2xf32>, vector<4x2xf32> -> vector<4x2xf32>
    %411 = arith.addf %410, %336 : vector<4x2xf32>
    %c8_108 = arith.constant 8 : index
    %c0_109 = arith.constant 0 : index
    %412 = vector.load %arg8[%c8_108, %c0_109] : memref<32x2xf32, #tpu.memory_space<vmem>>, vector<4x2xf32>
    tpu.vector_store %arg8[%c8_108, %c0_109], %411 {strides = array<i32>} : memref<32x2xf32, #tpu.memory_space<vmem>>, vector<4x2xf32>,
    %cst_110 = arith.constant dense<0.000000e+00> : vector<4xf32>
    %413 = vector.multi_reduction <add>, %214, %cst_110 [1] : vector<4x32xf32> to vector<4xf32>
    %414 = vector.shape_cast %413 : vector<4xf32> to vector<4x1xf32>
    %cst_111 = arith.constant 3.200000e+01 : f32
    %415 = vector.broadcast %cst_111 : f32 to vector<4x1xf32>
    %416 = arith.divf %414, %415 : vector<4x1xf32>
    %417 = arith.mulf %214, %214 : vector<4x32xf32>
    %cst_112 = arith.constant dense<0.000000e+00> : vector<4xf32>
    %418 = vector.multi_reduction <add>, %417, %cst_112 [1] : vector<4x32xf32> to vector<4xf32>
    %419 = vector.shape_cast %418 : vector<4xf32> to vector<4x1xf32>
    %cst_113 = arith.constant 3.200000e+01 : f32
    %420 = vector.broadcast %cst_113 : f32 to vector<4x1xf32>
    %421 = arith.divf %419, %420 : vector<4x1xf32>
    %422 = arith.mulf %416, %416 : vector<4x1xf32>
    %423 = arith.subf %421, %422 : vector<4x1xf32>
    %cst_114 = arith.constant 0.000000e+00 : f32
    %424 = vector.broadcast %cst_114 : f32 to vector<4x1xf32>
    %425 = arith.maximumf %423, %424 : vector<4x1xf32>
    %426 = vector.broadcast %416 : vector<4x1xf32> to vector<4x32xf32>
    %427 = arith.subf %214, %426 : vector<4x32xf32>
    %cst_115 = arith.constant 9.99999974E-6 : f32
    %428 = vector.broadcast %cst_115 : f32 to vector<4x1xf32>
    %429 = arith.addf %425, %428 : vector<4x1xf32>
    %430 = math.rsqrt %429 : vector<4x1xf32>
    %431 = vector.broadcast %430 : vector<4x1xf32> to vector<4x32xf32>
    %432 = arith.mulf %427, %431 : vector<4x32xf32>
    %433 = arith.mulf %432, %330 : vector<4x32xf32>
    %434 = arith.addf %433, %333 : vector<4x32xf32>
    %cst_116 = arith.constant dense<0.000000e+00> : vector<4x2xf32>
    %435 = tpu.matmul %434, %337, %cst_116 {dimension_numbers = #tpu.dot_dimension_numbers<[1], [0], [0], [1], [0, 0, 1, 1], [], []>} : vector<4x32xf32>, vector<32x2xf32>, vector<4x2xf32> -> vector<4x2xf32>
    %436 = arith.addf %435, %336 : vector<4x2xf32>
    %c12_117 = arith.constant 12 : index
    %c0_118 = arith.constant 0 : index
    %437 = vector.load %arg8[%c12_117, %c0_118] : memref<32x2xf32, #tpu.memory_space<vmem>>, vector<4x2xf32>
    tpu.vector_store %arg8[%c12_117, %c0_118], %436 {strides = array<i32>} : memref<32x2xf32, #tpu.memory_space<vmem>>, vector<4x2xf32>,
    %cst_119 = arith.constant dense<0.000000e+00> : vector<4xf32>
    %438 = vector.multi_reduction <add>, %242, %cst_119 [1] : vector<4x32xf32> to vector<4xf32>
    %439 = vector.shape_cast %438 : vector<4xf32> to vector<4x1xf32>
    %cst_120 = arith.constant 3.200000e+01 : f32
    %440 = vector.broadcast %cst_120 : f32 to vector<4x1xf32>
    %441 = arith.divf %439, %440 : vector<4x1xf32>
    %442 = arith.mulf %242, %242 : vector<4x32xf32>
    %cst_121 = arith.constant dense<0.000000e+00> : vector<4xf32>
    %443 = vector.multi_reduction <add>, %442, %cst_121 [1] : vector<4x32xf32> to vector<4xf32>
    %444 = vector.shape_cast %443 : vector<4xf32> to vector<4x1xf32>
    %cst_122 = arith.constant 3.200000e+01 : f32
    %445 = vector.broadcast %cst_122 : f32 to vector<4x1xf32>
    %446 = arith.divf %444, %445 : vector<4x1xf32>
    %447 = arith.mulf %441, %441 : vector<4x1xf32>
    %448 = arith.subf %446, %447 : vector<4x1xf32>
    %cst_123 = arith.constant 0.000000e+00 : f32
    %449 = vector.broadcast %cst_123 : f32 to vector<4x1xf32>
    %450 = arith.maximumf %448, %449 : vector<4x1xf32>
    %451 = vector.broadcast %441 : vector<4x1xf32> to vector<4x32xf32>
    %452 = arith.subf %242, %451 : vector<4x32xf32>
    %cst_124 = arith.constant 9.99999974E-6 : f32
    %453 = vector.broadcast %cst_124 : f32 to vector<4x1xf32>
    %454 = arith.addf %450, %453 : vector<4x1xf32>
    %455 = math.rsqrt %454 : vector<4x1xf32>
    %456 = vector.broadcast %455 : vector<4x1xf32> to vector<4x32xf32>
    %457 = arith.mulf %452, %456 : vector<4x32xf32>
    %458 = arith.mulf %457, %330 : vector<4x32xf32>
    %459 = arith.addf %458, %333 : vector<4x32xf32>
    %cst_125 = arith.constant dense<0.000000e+00> : vector<4x2xf32>
    %460 = tpu.matmul %459, %337, %cst_125 {dimension_numbers = #tpu.dot_dimension_numbers<[1], [0], [0], [1], [0, 0, 1, 1], [], []>} : vector<4x32xf32>, vector<32x2xf32>, vector<4x2xf32> -> vector<4x2xf32>
    %461 = arith.addf %460, %336 : vector<4x2xf32>
    %c16 = arith.constant 16 : index
    %c0_126 = arith.constant 0 : index
    %462 = vector.load %arg8[%c16, %c0_126] : memref<32x2xf32, #tpu.memory_space<vmem>>, vector<4x2xf32>
    tpu.vector_store %arg8[%c16, %c0_126], %461 {strides = array<i32>} : memref<32x2xf32, #tpu.memory_space<vmem>>, vector<4x2xf32>,
    %cst_127 = arith.constant dense<0.000000e+00> : vector<4xf32>
    %463 = vector.multi_reduction <add>, %270, %cst_127 [1] : vector<4x32xf32> to vector<4xf32>
    %464 = vector.shape_cast %463 : vector<4xf32> to vector<4x1xf32>
    %cst_128 = arith.constant 3.200000e+01 : f32
    %465 = vector.broadcast %cst_128 : f32 to vector<4x1xf32>
    %466 = arith.divf %464, %465 : vector<4x1xf32>
    %467 = arith.mulf %270, %270 : vector<4x32xf32>
    %cst_129 = arith.constant dense<0.000000e+00> : vector<4xf32>
    %468 = vector.multi_reduction <add>, %467, %cst_129 [1] : vector<4x32xf32> to vector<4xf32>
    %469 = vector.shape_cast %468 : vector<4xf32> to vector<4x1xf32>
    %cst_130 = arith.constant 3.200000e+01 : f32
    %470 = vector.broadcast %cst_130 : f32 to vector<4x1xf32>
    %471 = arith.divf %469, %470 : vector<4x1xf32>
    %472 = arith.mulf %466, %466 : vector<4x1xf32>
    %473 = arith.subf %471, %472 : vector<4x1xf32>
    %cst_131 = arith.constant 0.000000e+00 : f32
    %474 = vector.broadcast %cst_131 : f32 to vector<4x1xf32>
    %475 = arith.maximumf %473, %474 : vector<4x1xf32>
    %476 = vector.broadcast %466 : vector<4x1xf32> to vector<4x32xf32>
    %477 = arith.subf %270, %476 : vector<4x32xf32>
    %cst_132 = arith.constant 9.99999974E-6 : f32
    %478 = vector.broadcast %cst_132 : f32 to vector<4x1xf32>
    %479 = arith.addf %475, %478 : vector<4x1xf32>
    %480 = math.rsqrt %479 : vector<4x1xf32>
    %481 = vector.broadcast %480 : vector<4x1xf32> to vector<4x32xf32>
    %482 = arith.mulf %477, %481 : vector<4x32xf32>
    %483 = arith.mulf %482, %330 : vector<4x32xf32>
    %484 = arith.addf %483, %333 : vector<4x32xf32>
    %cst_133 = arith.constant dense<0.000000e+00> : vector<4x2xf32>
    %485 = tpu.matmul %484, %337, %cst_133 {dimension_numbers = #tpu.dot_dimension_numbers<[1], [0], [0], [1], [0, 0, 1, 1], [], []>} : vector<4x32xf32>, vector<32x2xf32>, vector<4x2xf32> -> vector<4x2xf32>
    %486 = arith.addf %485, %336 : vector<4x2xf32>
    %c20 = arith.constant 20 : index
    %c0_134 = arith.constant 0 : index
    %487 = vector.load %arg8[%c20, %c0_134] : memref<32x2xf32, #tpu.memory_space<vmem>>, vector<4x2xf32>
    tpu.vector_store %arg8[%c20, %c0_134], %486 {strides = array<i32>} : memref<32x2xf32, #tpu.memory_space<vmem>>, vector<4x2xf32>,
    %cst_135 = arith.constant dense<0.000000e+00> : vector<4xf32>
    %488 = vector.multi_reduction <add>, %298, %cst_135 [1] : vector<4x32xf32> to vector<4xf32>
    %489 = vector.shape_cast %488 : vector<4xf32> to vector<4x1xf32>
    %cst_136 = arith.constant 3.200000e+01 : f32
    %490 = vector.broadcast %cst_136 : f32 to vector<4x1xf32>
    %491 = arith.divf %489, %490 : vector<4x1xf32>
    %492 = arith.mulf %298, %298 : vector<4x32xf32>
    %cst_137 = arith.constant dense<0.000000e+00> : vector<4xf32>
    %493 = vector.multi_reduction <add>, %492, %cst_137 [1] : vector<4x32xf32> to vector<4xf32>
    %494 = vector.shape_cast %493 : vector<4xf32> to vector<4x1xf32>
    %cst_138 = arith.constant 3.200000e+01 : f32
    %495 = vector.broadcast %cst_138 : f32 to vector<4x1xf32>
    %496 = arith.divf %494, %495 : vector<4x1xf32>
    %497 = arith.mulf %491, %491 : vector<4x1xf32>
    %498 = arith.subf %496, %497 : vector<4x1xf32>
    %cst_139 = arith.constant 0.000000e+00 : f32
    %499 = vector.broadcast %cst_139 : f32 to vector<4x1xf32>
    %500 = arith.maximumf %498, %499 : vector<4x1xf32>
    %501 = vector.broadcast %491 : vector<4x1xf32> to vector<4x32xf32>
    %502 = arith.subf %298, %501 : vector<4x32xf32>
    %cst_140 = arith.constant 9.99999974E-6 : f32
    %503 = vector.broadcast %cst_140 : f32 to vector<4x1xf32>
    %504 = arith.addf %500, %503 : vector<4x1xf32>
    %505 = math.rsqrt %504 : vector<4x1xf32>
    %506 = vector.broadcast %505 : vector<4x1xf32> to vector<4x32xf32>
    %507 = arith.mulf %502, %506 : vector<4x32xf32>
    %508 = arith.mulf %507, %330 : vector<4x32xf32>
    %509 = arith.addf %508, %333 : vector<4x32xf32>
    %cst_141 = arith.constant dense<0.000000e+00> : vector<4x2xf32>
    %510 = tpu.matmul %509, %337, %cst_141 {dimension_numbers = #tpu.dot_dimension_numbers<[1], [0], [0], [1], [0, 0, 1, 1], [], []>} : vector<4x32xf32>, vector<32x2xf32>, vector<4x2xf32> -> vector<4x2xf32>
    %511 = arith.addf %510, %336 : vector<4x2xf32>
    %c24 = arith.constant 24 : index
    %c0_142 = arith.constant 0 : index
    %512 = vector.load %arg8[%c24, %c0_142] : memref<32x2xf32, #tpu.memory_space<vmem>>, vector<4x2xf32>
    tpu.vector_store %arg8[%c24, %c0_142], %511 {strides = array<i32>} : memref<32x2xf32, #tpu.memory_space<vmem>>, vector<4x2xf32>,
    %cst_143 = arith.constant dense<0.000000e+00> : vector<4xf32>
    %513 = vector.multi_reduction <add>, %326, %cst_143 [1] : vector<4x32xf32> to vector<4xf32>
    %514 = vector.shape_cast %513 : vector<4xf32> to vector<4x1xf32>
    %cst_144 = arith.constant 3.200000e+01 : f32
    %515 = vector.broadcast %cst_144 : f32 to vector<4x1xf32>
    %516 = arith.divf %514, %515 : vector<4x1xf32>
    %517 = arith.mulf %326, %326 : vector<4x32xf32>
    %cst_145 = arith.constant dense<0.000000e+00> : vector<4xf32>
    %518 = vector.multi_reduction <add>, %517, %cst_145 [1] : vector<4x32xf32> to vector<4xf32>
    %519 = vector.shape_cast %518 : vector<4xf32> to vector<4x1xf32>
    %cst_146 = arith.constant 3.200000e+01 : f32
    %520 = vector.broadcast %cst_146 : f32 to vector<4x1xf32>
    %521 = arith.divf %519, %520 : vector<4x1xf32>
    %522 = arith.mulf %516, %516 : vector<4x1xf32>
    %523 = arith.subf %521, %522 : vector<4x1xf32>
    %cst_147 = arith.constant 0.000000e+00 : f32
    %524 = vector.broadcast %cst_147 : f32 to vector<4x1xf32>
    %525 = arith.maximumf %523, %524 : vector<4x1xf32>
    %526 = vector.broadcast %516 : vector<4x1xf32> to vector<4x32xf32>
    %527 = arith.subf %326, %526 : vector<4x32xf32>
    %cst_148 = arith.constant 9.99999974E-6 : f32
    %528 = vector.broadcast %cst_148 : f32 to vector<4x1xf32>
    %529 = arith.addf %525, %528 : vector<4x1xf32>
    %530 = math.rsqrt %529 : vector<4x1xf32>
    %531 = vector.broadcast %530 : vector<4x1xf32> to vector<4x32xf32>
    %532 = arith.mulf %527, %531 : vector<4x32xf32>
    %533 = arith.mulf %532, %330 : vector<4x32xf32>
    %534 = arith.addf %533, %333 : vector<4x32xf32>
    %cst_149 = arith.constant dense<0.000000e+00> : vector<4x2xf32>
    %535 = tpu.matmul %534, %337, %cst_149 {dimension_numbers = #tpu.dot_dimension_numbers<[1], [0], [0], [1], [0, 0, 1, 1], [], []>} : vector<4x32xf32>, vector<32x2xf32>, vector<4x2xf32> -> vector<4x2xf32>
    %536 = arith.addf %535, %336 : vector<4x2xf32>
    %c28 = arith.constant 28 : index
    %c0_150 = arith.constant 0 : index
    %537 = vector.load %arg8[%c28, %c0_150] : memref<32x2xf32, #tpu.memory_space<vmem>>, vector<4x2xf32>
    tpu.vector_store %arg8[%c28, %c0_150], %536 {strides = array<i32>} : memref<32x2xf32, #tpu.memory_space<vmem>>, vector<4x2xf32>,
    return
  }
}

</mosaic_0001>

<bundles_post_ra>
// kernel: tpu_custom_call.1
= control target key start
LH: loop header
LB: loop body
LE: loop exit
PB: predicated region body
PF: predicated region fallthrough
CT: control target
= control target key end

     0   :  { %15 = vsyncpa [#allocation3], 0  ;;  %s4336_s0 = inlined_call_operand.vmem [shape: f32[32,32], index: 0, kind: input, shape index: {}]   ;;  %s4337_s1 = inlined_call_operand.hbm [shape: f32[4,32], index: 1, kind: input, shape index: {}]   ;;  %s4338_s2 = inlined_call_operand.hbm [shape: f32[13,384], index: 2, kind: input, shape index: {}]   ;;  %s4339_s3 = inlined_call_operand.hbm [shape: f32[32,32], index: 3, kind: input, shape index: {}]   ;;  %s4340_s4 = inlined_call_operand.hbm [shape: f32[32,32], index: 4, kind: input, shape index: {}]   ;;  %s4341_s5 = inlined_call_operand.hbm [shape: f32[32,384], index: 5, kind: input, shape index: {}]   ;;  %s4342_s6 = inlined_call_operand.hbm [shape: f32[32,384], index: 6, kind: input, shape index: {}]   ;;  %s4343_s7 = inlined_call_operand.vmem [shape: f32[32,2], index: 7, kind: input, shape index: {}]   ;;  %s4344_s8 = inlined_call_operand.vmem [shape: f32[32,2], index: 8, kind: output, shape index: {0}]   ;;  %s4345_s9 = inlined_call_operand.hbm [shape: f32[4,32], index: 9, kind: output, shape index: {1}]  }
   0x1   :  { %16 = vsyncpa [#allocation6], 0 }
   0x2   :  { %17 = vsyncpa [#allocation9], 0 }
   0x3   :  { %18 = vsyncpa [#allocation12], 0 }
   0x4   :  { %19 = vsyncpa [#allocation4], 0  ;;  %s3595_s30 = smov [#allocation5]  }
   0x5   :  { %s37_s10 = sshll.u32 %s3595_s30, 4  ;;  %s38_s10 = int_to_ptr.vmem [resolvable:$true] %s37_s10 }
   0x6   :  { %s3453_s11 = scalar_lea.vmem %s38_s10, 768  ;;  %p3458_p1 = scmp.lt.s32.totalorder %s38_s10, %s38_s10 }
   0x7   :  { %p3454_p0 = scmp.ne.s32.totalorder %s38_s10, %s3453_s11  ;;  %p3459_p2 = scmp.lt.s32.totalorder %s3453_s11, %s3453_s11 }
   0x9   :  { %p3460_p3 = por %p3459_p2, %p3458_p1 }
   0xb   :  { %p3461_p4 = pnand %p3460_p3, %p3454_p0 }
   0xd   :  { %3464 = shalt.err (!%p3461_p4)
}
   0xe   :  { %s3596_s12 = smov 384   ;;  %s3597_s13 = smov 24  }
   0xf   :  { %43 = dma.hbm_to_vmem [thread:$0]  %s4338_s2, 768, %s38_s10, [#allocation6], %s3596_s12, %s3596_s12, %s3597_s13  }
  0x10   :  { %s3598_s16 = smov [#allocation8]   ;;  %s3599_s18 = smov [#allocation2]  }
  0x11   :  { %s61_s17 = sshll.u32 %s3598_s16, 4  ;;  %s28_s19 = sshll.u32 %s3599_s18, 4  ;;  %s62_s17 = int_to_ptr.vmem [resolvable:$true] %s61_s17  ;;  %s29_s19 = int_to_ptr.vmem [resolvable:$true] %s28_s19 }
  0x12   :  { %s3473_s20 = scalar_lea.vmem %s62_s17, 512  ;;  %p3478_p6 = scmp.lt.s32.totalorder %s62_s17, %s62_s17 }
  0x13   :  { %p3474_p5 = scmp.ne.s32.totalorder %s62_s17, %s3473_s20  ;;  %p3479_p7 = scmp.lt.s32.totalorder %s3473_s20, %s3473_s20 }
  0x15   :  { %p3480_p8 = por %p3479_p7, %p3478_p6 }
  0x17   :  { %p3481_p9 = pnand %p3480_p8, %p3474_p5 }
  0x19   :  { %3484 = shalt.err (!%p3481_p9)
}
  0x1a   :  { %s3600_s21 = smov 128   ;;  %s3601_s22 = smov 8  }
  0x1b   :  { %67 = dma.hbm_to_vmem [thread:$0]  %s4340_s4, 512, %s62_s17, [#allocation9], %s3600_s21, %s3600_s21, %s3601_s22  }
  0x1c   :  { %s3493_s2 = scalar_lea.vmem %s29_s19, 64  ;;  %p3498_p11 = scmp.lt.s32.totalorder %s29_s19, %s29_s19 }
  0x1d   :  { %p3494_p10 = scmp.ne.s32.totalorder %s29_s19, %s3493_s2  ;;  %p3499_p12 = scmp.lt.s32.totalorder %s3493_s2, %s3493_s2 }
  0x1f   :  { %p3500_p13 = por %p3499_p12, %p3498_p11 }
  0x21   :  { %p3501_p0 = pnand %p3500_p13, %p3494_p10 }
  0x23   :  { %3504 = shalt.err (!%p3501_p0)
}
  0x24   :  { %31 = dma.hbm_to_vmem [thread:$0]  %s4337_s1, 64, %s29_s19, [#allocation3]  }
  0x25   :  { %s3602_s27 = smov [#allocation7]   ;;  %s3603_s29 = smov [#allocation10]  }
  0x26   :  { %s49_s28 = sshll.u32 %s3602_s27, 4  ;;  %s73_s30 = sshll.u32 %s3603_s29, 4  ;;  %s50_s28 = int_to_ptr.vmem [resolvable:$true] %s49_s28  ;;  %s74_s30 = int_to_ptr.vmem [resolvable:$true] %s73_s30 }
  0x27   :  { %s3513_s10 = scalar_lea.vmem %s50_s28, 512  ;;  %p3518_p2 = scmp.lt.s32.totalorder %s50_s28, %s50_s28 }
  0x28   :  { %p3514_p1 = scmp.ne.s32.totalorder %s50_s28, %s3513_s10  ;;  %p3519_p3 = scmp.lt.s32.totalorder %s3513_s10, %s3513_s10 }
  0x2a   :  { %p3520_p4 = por %p3519_p3, %p3518_p2 }
  0x2c   :  { %p3521_p5 = pnand %p3520_p4, %p3514_p1 }
  0x2e   :  { %3524 = shalt.err (!%p3521_p5)
}
  0x2f   :  { %55 = dma.hbm_to_vmem [thread:$0]  %s4339_s3, 512, %s50_s28, [#allocation6], %s3600_s21, %s3600_s21, %s3601_s22  }
  0x30   :  { %s3533_s14 = scalar_lea.vmem %s74_s30, 1536  ;;  %p3538_p7 = scmp.lt.s32.totalorder %s74_s30, %s74_s30 }
  0x31   :  { %p3534_p6 = scmp.ne.s32.totalorder %s74_s30, %s3533_s14  ;;  %p3539_p8 = scmp.lt.s32.totalorder %s3533_s14, %s3533_s14 }
  0x33   :  { %p3540_p9 = por %p3539_p8, %p3538_p7 }
  0x35   :  { %p3541_p10 = pnand %p3540_p9, %p3534_p6 }
  0x37   :  { %3544 = shalt.err (!%p3541_p10)
}
  0x38   :  { %79 = dma.hbm_to_vmem [thread:$0]  %s4341_s5, 1536, %s74_s30, [#allocation9], %s3596_s12, %s3596_s12, %s3597_s13  }
  0x39   :  { %s3604_s16 = smov [#allocation11]  }
  0x3a   :  { %s85_s17 = sshll.u32 %s3604_s16, 4  ;;  %s86_s17 = int_to_ptr.vmem [resolvable:$true] %s85_s17 }
  0x3b   :  { %s3553_s18 = scalar_lea.vmem %s86_s17, 1536  ;;  %p3558_p12 = scmp.lt.s32.totalorder %s86_s17, %s86_s17 }
  0x3c   :  { %p3554_p11 = scmp.ne.s32.totalorder %s86_s17, %s3553_s18  ;;  %p3559_p13 = scmp.lt.s32.totalorder %s3553_s18, %s3553_s18 }
  0x3e   :  { %p3560_p0 = por %p3559_p13, %p3558_p12 }
  0x40   :  { %p3561_p1 = pnand %p3560_p0, %p3554_p11 }
  0x42   :  { %3564 = shalt.err (!%p3561_p1)
}
  0x43   :  { %91 = dma.hbm_to_vmem [thread:$0]  %s4342_s6, 1536, %s86_s17, [#allocation12], %s3596_s12, %s3596_s12, %s3597_s13  }
  0x44   :  { %3585 = dma.done.wait [#allocation3], 64  }
  0x45   :  { %3586 = vsyncadd [#allocation3], 4294967232 }
  0x46   :  { %3587 = dma.done.wait [#allocation6], 1280  }
  0x47   :  { %3588 = vsyncadd [#allocation6], 4294966016 }
  0x48   :  { %3589 = dma.done.wait [#allocation9], 2048  }
  0x49   :  { %3590 = vsyncadd [#allocation9], 4294965248 }
  0x4a   :  { %3591 = dma.done.wait [#allocation12], 1536  }
  0x4b   :  { %3592 = vsyncadd [#allocation12], 4294965760  ;;  %vm118_vm0 = vcmask 261120   ;;  %v3688_v0 = vld [vmem:[%s4336_s0 + $0x18] sm:$0xff]  ;;  %v3693_v1 = vld [vmem:[%s4336_s0] sm:$0xff]  ;;  %vm3606_vm1 = vmmov 0  }
  0x4c   :  { %v3698_v2 = vld [vmem:[%s4336_s0 + $0x8] sm:$0xff]  ;;  %v128_v3 = vsel %vm118_vm0, %v3688_v0, 0.0  ;;  %v119_v4 = vsel %vm118_vm0, %v3693_v1, 0.0  ;;  %v136_v5 = vmul.f32 %v3693_v1, %v3693_v1  ;;  %v3714_v9 = vld [vmem:[%s4336_s0 + $0x10] sm:$0xff]  ;;  %v139_v12 = vmul.f32 %v3688_v0, %v3688_v0  ;;  %v193_v18 = vld [vmem:[#allocation7 + $0x8] sm:$0xff]  ;;  %s3607_s20 = smov [#allocation13]  }
  0x4d   :  { %129 = vadd.xlane.f32.xlu1 %v128_v3  ;;  %120 = vadd.xlane.f32.xlu0 %v119_v4  ;;  %v122_v7 = vsel %vm118_vm0, %v3698_v2, 0.0  ;;  %v137_v8 = vmul.f32 %v3698_v2, %v3698_v2  ;;  %v125_v11 = vsel %vm118_vm0, %v3714_v9, 0.0  ;;  %v138_v13 = vmul.f32 %v3714_v9, %v3714_v9  ;;  %v195_v16 = vld [vmem:[#allocation7 + $0x18] sm:$0xff]  ;;  %v194_v17 = vld [vmem:[#allocation7 + $0x10] sm:$0xff]  ;;  %v192_v19 = vld [vmem:[#allocation7] sm:$0xff]  ;;  %s2919_s21 = sshll.u32 %s3607_s20, 4  ;;  %s2920_s21 = int_to_ptr.vmem [resolvable:$true] %s2919_s21 }
  0x4e   :  { %v140_v6 = vsel %vm118_vm0, %v136_v5, 0.0  ;;  %v149_v14 = vsel %vm118_vm0, %v139_v12, 0.0  ;;  %3093 = vmatprep.subr.mxu0 %v195_v16  ;;  %v116_v54 = vld [vmem:[#allocation5] ss:$0 sm:$0xff]  ;;  %v117_v56 = vld [vmem:[#allocation5 + $0x1] ss:$0 sm:$0xff]  ;;  %p3570_p3 = scmp.lt.s32.totalorder %s2920_s21, %s2920_s21 }
  0x4f   :  { %v143_v10 = vsel %vm118_vm0, %v137_v8, 0.0  ;;  %v146_v15 = vsel %vm118_vm0, %v138_v13, 0.0  ;;  %3094 = vmatpush3.msra.mxu0 %v195_v16  ;;  %vm2169_vm2 = vcmask 257024   ;;  %vm2160_vm3 = vcmask 261124   ;;  %s3565_s22 = scalar_lea.vmem %s2920_s21, 64 }
  0x50   :  { %3095 = vmatprep.subr.mxu0 %v194_v17  ;;  %vm2261_vm4 = vcmask 11264   ;;  %p3566_p2 = scmp.ne.s32.totalorder %s2920_s21, %s3565_s22  ;;  %p3571_p4 = scmp.lt.s32.totalorder %s3565_s22, %s3565_s22 }
  0x51   :  { %141 = vadd.xlane.f32.xlu1 %v140_v6  ;;  %123 = vadd.xlane.f32.xlu0 %v122_v7 }
  0x52   :  { %3096 = vmatpush3.msra.mxu0 %v194_v17  ;;  %p3572_p5 = por %p3571_p4, %p3570_p3 }
  0x53   :  { %3097 = vmatprep.subr.mxu0 %v193_v18 }
  0x54   :  { %3098 = vmatpush3.msra.mxu0 %v193_v18  ;;  %p3573_p6 = pnand %p3572_p5, %p3566_p2 }
  0x55   :  { %144 = vadd.xlane.f32.xlu1 %v143_v10  ;;  %126 = vadd.xlane.f32.xlu0 %v125_v11 }
  0x56   :  { %3099 = vmatprep.subr.mxu0 %v192_v19 }
  0x57   :  { %3100 = vmatpush3.msra.mxu0 %v192_v19 }
  0x59   :  { %150 = vadd.xlane.f32.xlu1 %v149_v14  ;;  %147 = vadd.xlane.f32.xlu0 %v146_v15 }
  0xd6   :  { %v130_v20 = vpop.xlane.xlu1 %129  ;;  %v121_v21 = vpop.xlane.xlu0 %120 }
  0xd7   :  { %v132_v22 = vmul.f32 0.03125, %v121_v21  ;;  %v135_v30 = vmul.f32 0.03125, %v130_v20 }
  0xd9   :  { %v156_v23 = vmul.f32 %v132_v22, %v132_v22  ;;  %v159_v39 = vmul.f32 %v135_v30, %v135_v30  ;;  %v168_v52 = vsub.f32 %v3693_v1, %v132_v22  ;;  %v171_v62 = vsub.f32 %v3688_v0, %v135_v30  ;;  %v196_v0 = vld [vmem:[#allocation5 + $0x2] ss:$0 sm:$0xff] }
  0xda   :  { %v142_v24 = vpop.xlane.xlu1 %141  ;;  %v124_v25 = vpop.xlane.xlu0 %123 }
  0xdb   :  { %v152_v26 = vmul.f32 0.03125, %v142_v24  ;;  %v133_v27 = vmul.f32 0.03125, %v124_v25 }
  0xdd   :  { %v160_v28 = vsub.f32 %v152_v26, %v156_v23  ;;  %v157_v29 = vmul.f32 %v133_v27, %v133_v27  ;;  %v169_v57 = vsub.f32 %v3698_v2, %v133_v27 }
  0xde   :  { %v145_v31 = vpop.xlane.xlu1 %144  ;;  %v127_v32 = vpop.xlane.xlu0 %126 }
  0xdf   :  { %v164_v33 = vmax.f32 %v160_v28, 0.0  ;;  %v153_v34 = vmul.f32 0.03125, %v145_v31  ;;  %v134_v35 = vmul.f32 0.03125, %v127_v32 }
  0xe1   :  { %v172_v36 = vadd.f32 1e-05, %v164_v33  ;;  %v161_v37 = vsub.f32 %v153_v34, %v157_v29  ;;  %v158_v38 = vmul.f32 %v134_v35, %v134_v35  ;;  %v170_v4 = vsub.f32 %v3714_v9, %v134_v35  ;;  %v375_v35 = vld [vmem:[#allocation8 + $0x18] sm:$0xff] }
  0xe2   :  { %v151_v40 = vpop.xlane.xlu1 %150  ;;  %v148_v41 = vpop.xlane.xlu0 %147  ;;  %3107 = vmatprep.subr.mxu1 %v375_v35 }
  0xe3   :  { %3324 = vrsqrt.f32 %v172_v36  ;;  %v165_v42 = vmax.f32 %v161_v37, 0.0  ;;  %v155_v43 = vmul.f32 0.03125, %v151_v40  ;;  %v154_v44 = vmul.f32 0.03125, %v148_v41  ;;  %v374_v36 = vld [vmem:[#allocation8 + $0x10] sm:$0xff]  ;;  %3108 = vmatpush3.msra.mxu1 %v375_v35  ;;  %v373_v37 = vld [vmem:[#allocation8 + $0x8] sm:$0xff] }
  0xe4   :  { %3109 = vmatprep.subr.mxu1 %v374_v36 }
  0xe5   :  { %v173_v45 = vadd.f32 1e-05, %v165_v42  ;;  %v163_v46 = vsub.f32 %v155_v43, %v159_v39  ;;  %v162_v47 = vsub.f32 %v154_v44, %v158_v38  ;;  %3110 = vmatpush3.msra.mxu1 %v374_v36  ;;  %v372_v38 = vld [vmem:[#allocation8] sm:$0xff] }
  0xe6   :  { %3111 = vmatprep.subr.mxu1 %v373_v37 }
  0xe7   :  { %3326 = vrsqrt.f32 %v173_v45  ;;  %v167_v48 = vmax.f32 %v163_v46, 0.0  ;;  %v166_v49 = vmax.f32 %v162_v47, 0.0  ;;  %3112 = vmatpush3.msra.mxu1 %v373_v37 }
  0xe8   :  { %3113 = vmatprep.subr.mxu1 %v372_v38 }
  0xe9   :  { %v175_v50 = vadd.f32 1e-05, %v167_v48  ;;  %v174_v51 = vadd.f32 1e-05, %v166_v49  ;;  %3114 = vmatpush3.msra.mxu1 %v372_v38 }
  0xeb   :  { %3328 = vrsqrt.f32 %v175_v50 }
  0xec   :  { %3330 = vrsqrt.f32 %v174_v51 }
  0xf0   :  { %v3325_v53 = vpop.eup %3324 }
  0xf1   :  { %v180_v55 = vmul.f32 %v3325_v53, %v168_v52 }
  0xf3   :  { %v184_v58 = vmul.f32 %v180_v55, %v116_v54 }
  0xf4   :  { %v3327_v59 = vpop.eup %3326 }
  0xf5   :  { %v188_v60 = vadd.f32 %v184_v58, %v117_v56  ;;  %v181_v61 = vmul.f32 %v3327_v59, %v169_v57 }
  0xf7   :  { %3101 = vmatprep.mubr.msk.f32.mxu0 %vm118_vm0, %v188_v60  ;;  %v185_v63 = vmul.f32 %v181_v61, %v116_v54 }
  0xf8   :  { %v3329_v3 = vpop.eup %3328 }
  0xf9   :  { %v3331_v5 = vpop.eup %3330  ;;  %v189_v1 = vadd.f32 %v185_v63, %v117_v56  ;;  %v183_v6 = vmul.f32 %v3329_v3, %v171_v62 }
  0xfa   :  { %v182_v7 = vmul.f32 %v3331_v5, %v170_v4 }
  0xfb   :  { %3102 = vmatmul.mubr.msk.f32.vlgmr.msra.gmra.mxu0 %vm118_vm0, %v189_v1  ;;  %v187_v8 = vmul.f32 %v183_v6, %v116_v54 }
  0xfc   :  { %v186_v2 = vmul.f32 %v182_v7, %v116_v54 }
  0xfd   :  { %v191_v10 = vadd.f32 %v187_v8, %v117_v56 }
  0xfe   :  { %v190_v11 = vadd.f32 %v186_v2, %v117_v56 }
 0x100   :  { %3104 = vmatprep.mubr.msk.f32.mxu0 %vm118_vm0, %v190_v11 }
 0x101   :  { %3105 = vmatmul.mubr.msk.f32.gmra.mxu0 %vm118_vm0, %v191_v10 }
 0x1bb   :  { %v3103_v12 = vpop.f32.mrf.mxu0 }
 0x1bc   :  { %v281_v13 = vadd.f32 %v3103_v12, %v196_v0 }
 0x1bd   :  { %v275_v14 = vpop.f32.mrf.mxu0 }
 0x1be   :  { %v3733_v15 = vmax.f32 %v281_v13, 0.0  ;;  %v276_v9 = vadd.f32 %v275_v14, %v196_v0 }
 0x1c0   :  { %v3735_v16 = vmax.f32 %v276_v9, 0.0  ;;  %v303_v17 = vsel %vm118_vm0, %v3733_v15, 0.0  ;;  %v317_v18 = vmul.f32 %v3733_v15, %v3733_v15 }
 0x1c1   :  { %v3106_v19 = vpop.f32.mrf.mxu0  ;;  %304 = vadd.xlane.f32.xlu1 %v303_v17  ;;  %v299_v17 = vld [vmem:[#allocation5 + $0x4] ss:$0 sm:$0xff] }
 0x1c2   :  { %v291_v20 = vadd.f32 %v3106_v19, %v196_v0  ;;  %v300_v21 = vsel %vm118_vm0, %v3735_v16, 0.0  ;;  %v316_v22 = vmul.f32 %v3735_v16, %v3735_v16  ;;  %v323_v26 = vsel %vm118_vm0, %v317_v18, 0.0 }
 0x1c3   :  { %v285_v23 = vpop.f32.mrf.mxu0  ;;  %301 = vadd.xlane.f32.xlu0 %v300_v21 }
 0x1c4   :  { %v3745_v24 = vmax.f32 %v291_v20, 0.0  ;;  %v286_v25 = vadd.f32 %v285_v23, %v196_v0  ;;  %v320_v28 = vsel %vm118_vm0, %v316_v22, 0.0  ;;  %v298_v0 = vld [vmem:[#allocation5 + $0x3] ss:$0 sm:$0xff] }
 0x1c5   :  { %324 = vadd.xlane.f32.xlu1 %v323_v26 }
 0x1c6   :  { %v3748_v27 = vmax.f32 %v286_v25, 0.0  ;;  %v309_v29 = vsel %vm118_vm0, %v3745_v24, 0.0  ;;  %v319_v30 = vmul.f32 %v3745_v24, %v3745_v24 }
 0x1c7   :  { %321 = vadd.xlane.f32.xlu0 %v320_v28 }
 0x1c8   :  { %v306_v31 = vsel %vm118_vm0, %v3748_v27, 0.0  ;;  %v318_v32 = vmul.f32 %v3748_v27, %v3748_v27  ;;  %v329_v33 = vsel %vm118_vm0, %v319_v30, 0.0 }
 0x1c9   :  { %310 = vadd.xlane.f32.xlu1 %v309_v29 }
 0x1ca   :  { %v326_v34 = vsel %vm118_vm0, %v318_v32, 0.0 }
 0x1cb   :  { %307 = vadd.xlane.f32.xlu0 %v306_v31 }
 0x1cd   :  { %330 = vadd.xlane.f32.xlu1 %v329_v33 }
 0x1cf   :  { %327 = vadd.xlane.f32.xlu0 %v326_v34 }
 0x24a   :  { %v305_v39 = vpop.xlane.xlu1 %304 }
 0x24b   :  { %v313_v40 = vmul.f32 0.03125, %v305_v39 }
 0x24c   :  { %v302_v41 = vpop.xlane.xlu0 %301 }
 0x24d   :  { %v312_v42 = vmul.f32 0.03125, %v302_v41  ;;  %v337_v44 = vmul.f32 %v313_v40, %v313_v40  ;;  %v349_v2 = vsub.f32 %v3733_v15, %v313_v40 }
 0x24e   :  { %v325_v43 = vpop.xlane.xlu1 %324 }
 0x24f   :  { %v333_v45 = vmul.f32 0.03125, %v325_v43  ;;  %v336_v47 = vmul.f32 %v312_v42, %v312_v42  ;;  %v348_v11 = vsub.f32 %v3735_v16, %v312_v42 }
 0x250   :  { %v322_v46 = vpop.xlane.xlu0 %321 }
 0x251   :  { %v341_v48 = vsub.f32 %v333_v45, %v337_v44  ;;  %v332_v49 = vmul.f32 0.03125, %v322_v46 }
 0x252   :  { %v311_v50 = vpop.xlane.xlu1 %310 }
 0x253   :  { %v345_v51 = vmax.f32 %v341_v48, 0.0  ;;  %v340_v52 = vsub.f32 %v332_v49, %v336_v47  ;;  %v315_v53 = vmul.f32 0.03125, %v311_v50 }
 0x254   :  { %v308_v54 = vpop.xlane.xlu0 %307 }
 0x255   :  { %v353_v55 = vadd.f32 1e-05, %v345_v51  ;;  %v344_v56 = vmax.f32 %v340_v52, 0.0  ;;  %v314_v57 = vmul.f32 0.03125, %v308_v54  ;;  %v339_v60 = vmul.f32 %v315_v53, %v315_v53  ;;  %v562_v54 = vld [vmem:[#allocation10 + $0x50] sm:$0xff] }
 0x256   :  { %v331_v58 = vpop.xlane.xlu1 %330  ;;  %v351_v19 = vsub.f32 %v3745_v24, %v315_v53  ;;  %v376_v24 = vld [vmem:[#allocation5 + $0x5] ss:$0 sm:$0xff]  ;;  %618 = vmatprep.subr.mxu0 %v562_v54  ;;  %v3805_v54 = vld [vmem:[#allocation11 + $0x48] sm:$0xff] }
 0x257   :  { %3332 = vrsqrt.f32 %v353_v55  ;;  %v352_v59 = vadd.f32 1e-05, %v344_v56  ;;  %v335_v61 = vmul.f32 0.03125, %v331_v58  ;;  %v338_v63 = vmul.f32 %v314_v57, %v314_v57  ;;  %v561_v55 = vld [vmem:[#allocation10 + $0x48] sm:$0xff]  ;;  %v563_v56 = vld [vmem:[#allocation10 + $0x58] sm:$0xff]  ;;  %v558_v58 = vld [vmem:[#allocation10 + $0x30] sm:$0xff] }
 0x258   :  { %v328_v62 = vpop.xlane.xlu0 %327  ;;  %v350_v23 = vsub.f32 %v3748_v27, %v314_v57  ;;  %619 = vmatpush1.msra.mxu0 %v561_v55  ;;  %3121 = vmatprep.subr.mxu1 %v563_v56  ;;  %v559_v57 = vld [vmem:[#allocation10 + $0x38] sm:$0xff] }
 0x259   :  { %3334 = vrsqrt.f32 %v352_v59  ;;  %v343_v3 = vsub.f32 %v335_v61, %v339_v60  ;;  %v334_v4 = vmul.f32 0.03125, %v328_v62  ;;  %v560_v59 = vld [vmem:[#allocation10 + $0x40] sm:$0xff]  ;;  %620 = vmatprep.subr.mxu0 %v559_v57  ;;  %v555_v61 = vld [vmem:[#allocation10 + $0x18] sm:$0xff]  ;;  %v557_v62 = vld [vmem:[#allocation10 + $0x28] sm:$0xff] }
 0x25a   :  { %v556_v60 = vld [vmem:[#allocation10 + $0x20] sm:$0xff]  ;;  %621 = vmatpush1.msra.mxu0 %v558_v58  ;;  %v3807_v55 = vld [vmem:[#allocation11 + $0x58] sm:$0xff] }
 0x25b   :  { %v347_v5 = vmax.f32 %v343_v3, 0.0  ;;  %v342_v1 = vsub.f32 %v334_v4, %v338_v63  ;;  %v553_v63 = vld [vmem:[#allocation10 + $0x8] sm:$0xff]  ;;  %622 = vmatprep.subr.mxu0 %v556_v60  ;;  %v552_v3 = vld [vmem:[#allocation10] sm:$0xff]  ;;  %v554_v4 = vld [vmem:[#allocation10 + $0x10] sm:$0xff] }
 0x25c   :  { %623 = vmatpush1.msra.mxu0 %v555_v61  ;;  %v3823_v60 = vld [vmem:[#allocation11 + $0x18] sm:$0xff]  ;;  %v3826_v61 = vld [vmem:[#allocation11 + $0x40] sm:$0xff] }
 0x25d   :  { %v355_v6 = vadd.f32 1e-05, %v347_v5  ;;  %v346_v7 = vmax.f32 %v342_v1, 0.0  ;;  %624 = vmatprep.subr.mxu0 %v553_v63  ;;  %v3605_v5 = vmov 0.0   ;;  %v3799_v1 = vld [vmem:[#allocation11 + $0x50] sm:$0xff]  ;;  %v3830_v63 = vld [vmem:[#allocation11 + $0x8] sm:$0xff] }
 0x25e   :  { %625 = vmatpush1.msra.mxu0 %v552_v3  ;;  %658 = vmatprep.mubr.f32.mxu0 %v3605_v5 }
 0x25f   :  { %3336 = vrsqrt.f32 %v355_v6  ;;  %v354_v8 = vadd.f32 1e-05, %v346_v7  ;;  %3135 = vmatprep.subr.mxu0 %v3605_v5 }
 0x261   :  { %3338 = vrsqrt.f32 %v354_v8 }
 0x264   :  { %v3333_v10 = vpop.eup %3332 }
 0x265   :  { %v361_v12 = vmul.f32 %v3333_v10, %v349_v2 }
 0x266   :  { %v3335_v13 = vpop.eup %3334 }
 0x267   :  { %v360_v14 = vmul.f32 %v3335_v13, %v348_v11  ;;  %v365_v9 = vmul.f32 %v361_v12, %v298_v0 }
 0x269   :  { %v364_v18 = vmul.f32 %v360_v14, %v298_v0  ;;  %v369_v22 = vadd.f32 %v365_v9, %v299_v17 }
 0x26b   :  { %v368_v20 = vadd.f32 %v364_v18, %v299_v17 }
 0x26c   :  { %v3337_v21 = vpop.eup %3336 }
 0x26d   :  { %3115 = vmatprep.mubr.msk.f32.mxu1 %vm118_vm0, %v368_v20  ;;  %v363_v15 = vmul.f32 %v3337_v21, %v351_v19 }
 0x26e   :  { %v3339_v25 = vpop.eup %3338  ;;  %3116 = vmatmul.mubr.msk.f32.vlgmr.msra.gmra.mxu1 %vm118_vm0, %v369_v22 }
 0x26f   :  { %v362_v16 = vmul.f32 %v3339_v25, %v350_v23  ;;  %v367_v26 = vmul.f32 %v363_v15, %v298_v0  ;;  %3122 = vmatpush3.msra.mxu1 %v563_v56 }
 0x270   :  { %3123 = vmatprep.subr.mxu1 %v560_v59 }
 0x271   :  { %v366_v28 = vmul.f32 %v362_v16, %v298_v0  ;;  %v371_v30 = vadd.f32 %v367_v26, %v299_v17  ;;  %3124 = vmatpush3.msra.mxu1 %v560_v59  ;;  %v3819_v59 = vld [vmem:[#allocation11 + $0x20] sm:$0xff] }
 0x272   :  { %3125 = vmatprep.subr.mxu1 %v557_v62 }
 0x273   :  { %v370_v29 = vadd.f32 %v366_v28, %v299_v17  ;;  %3126 = vmatpush3.msra.mxu1 %v557_v62 }
 0x274   :  { %3127 = vmatprep.subr.mxu1 %v554_v4 }
 0x275   :  { %3118 = vmatprep.mubr.msk.f32.mxu1 %vm118_vm0, %v370_v29  ;;  %3128 = vmatpush3.msra.mxu1 %v554_v4 }
 0x276   :  { %3119 = vmatmul.mubr.msk.f32.gmra.mxu1 %vm118_vm0, %v371_v30  ;;  %809 = vmatprep.subr.mxu1 %v3799_v1 }
 0x32e   :  { %v3117_v31 = vpop.f32.mrf.mxu1 }
 0x32f   :  { %v461_v32 = vadd.f32 %v3117_v31, %v376_v24 }
 0x330   :  { %v455_v33 = vpop.f32.mrf.mxu1 }
 0x331   :  { %v3769_v27 = vmax.f32 %v461_v32, 0.0  ;;  %v456_v34 = vadd.f32 %v455_v33, %v376_v24 }
 0x333   :  { %v3771_v35 = vmax.f32 %v456_v34, 0.0  ;;  %v483_v36 = vsel %vm118_vm0, %v3769_v27, 0.0  ;;  %v497_v37 = vmul.f32 %v3769_v27, %v3769_v27 }
 0x334   :  { %484 = vadd.xlane.f32.xlu1 %v483_v36 }
 0x335   :  { %v480_v38 = vsel %vm118_vm0, %v3771_v35, 0.0  ;;  %v496_v39 = vmul.f32 %v3771_v35, %v3771_v35  ;;  %v503_v42 = vsel %vm118_vm0, %v497_v37, 0.0 }
 0x336   :  { %481 = vadd.xlane.f32.xlu0 %v480_v38  ;;  %v3120_v40 = vpop.f32.mrf.mxu1 }
 0x337   :  { %v471_v41 = vadd.f32 %v3120_v40, %v376_v24  ;;  %v500_v46 = vsel %vm118_vm0, %v496_v39, 0.0 }
 0x338   :  { %504 = vadd.xlane.f32.xlu1 %v503_v42  ;;  %v465_v43 = vpop.f32.mrf.mxu1  ;;  %v478_v42 = vld [vmem:[#allocation5 + $0x6] ss:$0 sm:$0xff] }
 0x339   :  { %v3782_v44 = vmax.f32 %v471_v41, 0.0  ;;  %v466_v45 = vadd.f32 %v465_v43, %v376_v24 }
 0x33a   :  { %501 = vadd.xlane.f32.xlu0 %v500_v46 }
 0x33b   :  { %v3785_v47 = vmax.f32 %v466_v45, 0.0  ;;  %v489_v48 = vsel %vm118_vm0, %v3782_v44, 0.0  ;;  %v499_v49 = vmul.f32 %v3782_v44, %v3782_v44 }
 0x33c   :  { %490 = vadd.xlane.f32.xlu1 %v489_v48  ;;  %v479_v48 = vld [vmem:[#allocation5 + $0x7] ss:$0 sm:$0xff] }
 0x33d   :  { %v486_v50 = vsel %vm118_vm0, %v3785_v47, 0.0  ;;  %v498_v51 = vmul.f32 %v3785_v47, %v3785_v47  ;;  %v509_v52 = vsel %vm118_vm0, %v499_v49, 0.0 }
 0x33e   :  { %487 = vadd.xlane.f32.xlu0 %v486_v50 }
 0x33f   :  { %v506_v53 = vsel %vm118_vm0, %v498_v51, 0.0 }
 0x340   :  { %510 = vadd.xlane.f32.xlu1 %v509_v52 }
 0x342   :  { %507 = vadd.xlane.f32.xlu0 %v506_v53 }
 0x3bd   :  { %v485_v6 = vpop.xlane.xlu1 %484 }
 0x3be   :  { %v493_v7 = vmul.f32 0.03125, %v485_v6  ;;  %v3837_v6 = vld [vmem:[#allocation11] sm:$0xff] }
 0x3bf   :  { %v482_v8 = vpop.xlane.xlu0 %481 }
 0x3c0   :  { %v492_v2 = vmul.f32 0.03125, %v482_v8  ;;  %v517_v11 = vmul.f32 %v493_v7, %v493_v7  ;;  %v529_v38 = vsub.f32 %v3769_v27, %v493_v7  ;;  %v3842_v7 = vld [vmem:[#allocation11 + $0x28] sm:$0xff] }
 0x3c1   :  { %v505_v10 = vpop.xlane.xlu1 %504  ;;  %v3848_v8 = vld [vmem:[#allocation2] sm:$0xf] }
 0x3c2   :  { %v513_v0 = vmul.f32 0.03125, %v505_v10  ;;  %v516_v13 = vmul.f32 %v492_v2, %v492_v2  ;;  %v528_v40 = vsub.f32 %v3771_v35, %v492_v2  ;;  %v3812_v35 = vld [vmem:[#allocation11 + $0x38] sm:$0xff]  ;;  %v3850_v2 = vld [vmem:[#allocation11 + $0x10] sm:$0xff]  ;;  %v567_v10 = vlaneseq }
 0x3c3   :  { %v502_v12 = vpop.xlane.xlu0 %501 }
 0x3c4   :  { %v521_v14 = vsub.f32 %v513_v0, %v517_v11  ;;  %v512_v9 = vmul.f32 0.03125, %v502_v12  ;;  %v568_v11 = vshrl.u32 %v567_v10, 7  ;;  %v565_v12 = vld [vmem:[#allocation5 + $0x1b] ss:$8 sm:$0x7] }
 0x3c5   :  { %v491_v17 = vpop.xlane.xlu1 %490 }
 0x3c6   :  { %v525_v18 = vmax.f32 %v521_v14, 0.0  ;;  %v520_v19 = vsub.f32 %v512_v9, %v516_v13  ;;  %v495_v20 = vmul.f32 0.03125, %v491_v17  ;;  %v577_v0 = vsub.s32 2, %v568_v11 }
 0x3c7   :  { %v488_v21 = vpop.xlane.xlu0 %487  ;;  %v569_v14 = vsub.s32 0, %v568_v11 }
 0x3c8   :  { %v533_v22 = vadd.f32 1e-05, %v525_v18  ;;  %v524_v23 = vmax.f32 %v520_v19, 0.0  ;;  %v494_v15 = vmul.f32 0.03125, %v488_v21  ;;  %v519_v26 = vmul.f32 %v495_v20, %v495_v20 }
 0x3c9   :  { %v511_v25 = vpop.xlane.xlu1 %510  ;;  %v531_v50 = vsub.f32 %v3782_v44, %v495_v20  ;;  %v3816_v44 = vld [vmem:[#allocation11 + $0x30] sm:$0xff]  ;;  %v578_v13 = vrot.slane %v565_v12, %v577_v0  ;;  %v573_v18 = vsub.s32 1, %v568_v11  ;;  %v570_v21 = vrot.slane %v565_v12, %v569_v14 }
 0x3ca   :  { %3340 = vrsqrt.f32 %v533_v22  ;;  %v532_v16 = vadd.f32 1e-05, %v524_v23  ;;  %v515_v28 = vmul.f32 0.03125, %v511_v25  ;;  %v518_v30 = vmul.f32 %v494_v15, %v494_v15 }
 0x3cb   :  { %v508_v29 = vpop.xlane.xlu0 %507  ;;  %v530_v27 = vsub.f32 %v3785_v47, %v494_v15  ;;  %v574_v23 = vrot.slane %v565_v12, %v573_v18 }
 0x3cc   :  { %3342 = vrsqrt.f32 %v532_v16  ;;  %v523_v24 = vsub.f32 %v515_v28, %v519_v26  ;;  %v514_v31 = vmul.f32 0.03125, %v508_v29 }
 0x3ce   :  { %v527_v32 = vmax.f32 %v523_v24, 0.0  ;;  %v522_v33 = vsub.f32 %v514_v31, %v518_v30 }
 0x3d0   :  { %v535_v34 = vadd.f32 1e-05, %v527_v32  ;;  %v526_v36 = vmax.f32 %v522_v33, 0.0 }
 0x3d2   :  { %3344 = vrsqrt.f32 %v535_v34  ;;  %v534_v37 = vadd.f32 1e-05, %v526_v36 }
 0x3d4   :  { %3346 = vrsqrt.f32 %v534_v37 }
 0x3d7   :  { %v3341_v39 = vpop.eup %3340 }
 0x3d8   :  { %v541_v41 = vmul.f32 %v3341_v39, %v529_v38 }
 0x3d9   :  { %v3343_v43 = vpop.eup %3342 }
 0x3da   :  { %v540_v45 = vmul.f32 %v3343_v43, %v528_v40  ;;  %v545_v46 = vmul.f32 %v541_v41, %v478_v42 }
 0x3dc   :  { %v544_v49 = vmul.f32 %v540_v45, %v478_v42  ;;  %v549_v53 = vadd.f32 %v545_v46, %v479_v48 }
 0x3de   :  { %v548_v51 = vadd.f32 %v544_v49, %v479_v48 }
 0x3df   :  { %v3345_v52 = vpop.eup %3344 }
 0x3e0   :  { %2941 = vmatmul.mubr.msk.f32.vlgmr.msra.gmra.mxu0 %vm118_vm0, %v548_v51  ;;  %3129 = vmatprep.mubr.msk.f32.mxu1 %vm118_vm0, %v548_v51  ;;  %v543_v56 = vmul.f32 %v3345_v52, %v531_v50 }
 0x3e1   :  { %v3347_v57 = vpop.eup %3346  ;;  %3130 = vmatmul.mubr.msk.f32.vlgmr.msra.gmra.mxu1 %vm118_vm0, %v549_v53  ;;  %664 = vmatprep.mubr.f32.mxu0 %v3605_v5 }
 0x3e2   :  { %810 = vmatpush1.msra.mxu1 %v3805_v54  ;;  %v542_v58 = vmul.f32 %v3347_v57, %v530_v27  ;;  %3136 = vmatpush3.msra.mxu0 %v3807_v55  ;;  %v547_v47 = vmul.f32 %v543_v56, %v478_v42  ;;  %v3904_v56 = vld [vmem:[#allocation5 + $0x1c] ss:$0 sm:$0xff] }
 0x3e3   :  { %811 = vmatprep.subr.mxu1 %v3812_v35  ;;  %3137 = vmatprep.subr.mxu0 %v3605_v5 }
 0x3e4   :  { %2942 = vmatmul.mubr.msk.f32.gmra.mxu0 %vm118_vm0, %v549_v53  ;;  %812 = vmatpush1.msra.mxu1 %v3816_v44  ;;  %v546_v62 = vmul.f32 %v542_v58, %v478_v42  ;;  %v551_v4 = vadd.f32 %v547_v47, %v479_v48 }
 0x3e5   :  { %670 = vmatprep.mubr.f32.mxu0 %v3605_v5  ;;  %813 = vmatprep.subr.mxu1 %v3819_v59 }
 0x3e6   :  { %v550_v3 = vadd.f32 %v546_v62, %v479_v48  ;;  %814 = vmatpush1.msra.mxu1 %v3823_v60  ;;  %3138 = vmatpush3.msra.mxu0 %v3826_v61 }
 0x3e7   :  { %815 = vmatprep.subr.mxu1 %v3830_v63  ;;  %3139 = vmatprep.subr.mxu0 %v3605_v5 }
 0x3e8   :  { %2943 = vmatmul.mubr.msk.f32.gmra.mxu0 %vm118_vm0, %v550_v3  ;;  %3132 = vmatprep.mubr.msk.f32.mxu1 %vm118_vm0, %v550_v3 }
 0x3e9   :  { %3133 = vmatmul.mubr.msk.f32.gmra.mxu1 %vm118_vm0, %v551_v4  ;;  %676 = vmatprep.mubr.f32.mxu0 %v3605_v5 }
 0x3ea   :  { %816 = vmatpush1.msra.mxu1 %v3837_v6  ;;  %849 = vmatprep.mubr.f32.mxu1 %v3605_v5 }
 0x3eb   :  { %3140 = vmatpush3.msra.mxu0 %v3842_v7  ;;  %975 = vmatprep.subr.mxu1 %v3799_v1 }
 0x3ec   :  { %2944 = vmatmul.mubr.msk.f32.gmra.mxu0 %vm118_vm0, %v551_v4  ;;  %3141 = vmatprep.subr.mxu0 %v3605_v5 }
 0x3ed   :  { %2949 = vmatmul.mubr.msk.f32.vlgmr.msra.gmra.mxu1 %vm118_vm0, %v3848_v8  ;;  %3142 = vmatpush3.msra.mxu0 %v3850_v2 }
 0x3ee   :  { %3143 = vmatprep.mubr.msk.f32.mxu0 %vm3606_vm1, %v3605_v5  ;;  %3146 = vmatprep.subr.mxu0 %v3605_v5 }
 0x3ef   :  { %976 = vmatpush1.msra.mxu1 %v3805_v54  ;;  %1015 = vmatprep.mubr.f32.mxu1 %v3605_v5 }
 0x3f0   :  { %3144 = vmatmul.mubr.msk.f32.vlgmr.msra.gmra.mxu0 %vm118_vm0, %v3848_v8  ;;  %977 = vmatprep.subr.mxu1 %v3812_v35 }
 0x3f1   :  { %3147 = vmatpush3.msra.mxu0 %v3807_v55  ;;  %978 = vmatpush1.msra.mxu1 %v3816_v44 }
 0x3f2   :  { %3148 = vmatprep.subr.mxu0 %v3605_v5  ;;  %979 = vmatprep.subr.mxu1 %v3819_v59 }
 0x3f3   :  { %3149 = vmatpush3.msra.mxu0 %v3826_v61  ;;  %980 = vmatpush1.msra.mxu1 %v3823_v60 }
 0x3f4   :  { %3150 = vmatprep.subr.mxu0 %v3605_v5  ;;  %981 = vmatprep.subr.mxu1 %v3830_v63 }
 0x3f5   :  { %3151 = vmatpush3.msra.mxu0 %v3842_v7  ;;  %982 = vmatpush1.msra.mxu1 %v3837_v6 }
 0x3f6   :  { %3152 = vmatprep.subr.mxu0 %v3605_v5  ;;  %3154 = vmatprep.mubr.msk.f32.mxu0 %vm3606_vm1, %v3605_v5 }
 0x3f7   :  { %3153 = vmatpush3.msra.mxu0 %v3850_v2  ;;  %1153 = vmatprep.subr.mxu1 %v3799_v1 }
 0x3f8   :  { %3157 = vmatprep.subr.mxu0 %v3605_v5 }
 0x4a0   :  { %v660_v9 = vpop.f32.mrf.mxu0 }
 0x4a1   :  { %v3131_v17 = vpop.f32.mrf.mxu1  ;;  %v3895_v34 = vadd.f32 %v660_v9, %v570_v21 }
 0x4a2   :  { %v3883_v19 = vadd.f32 %v3131_v17, %v578_v13  ;;  %v662_v20 = vpop.f32.mrf.mxu0 }
 0x4a3   :  { %v749_v16 = vpop.f32.mrf.mxu1  ;;  %v663_v48 = vadd.f32 %v662_v20, %v574_v23 }
 0x4a4   :  { %v666_v22 = vpop.f32.mrf.mxu0  ;;  %v750_v62 = vadd.f32 %v749_v16, %v578_v13 }
 0x4a5   :  { %v3885_v15 = vadd.f32 %v666_v22, %v570_v21 }
 0x4a6   :  { %v668_v25 = vpop.f32.mrf.mxu0 }
 0x4a7   :  { %v3887_v26 = vadd.f32 %v668_v25, %v574_v23 }
 0x4a8   :  { %v672_v28 = vpop.f32.mrf.mxu0 }
 0x4a9   :  { %v3889_v29 = vadd.f32 %v672_v28, %v570_v21  ;;  %v3134_v30 = vpop.f32.mrf.mxu1 }
 0x4aa   :  { %v3891_v24 = vadd.f32 %v3134_v30, %v578_v13  ;;  %v674_v31 = vpop.f32.mrf.mxu0 }
 0x4ab   :  { %v3893_v32 = vadd.f32 %v674_v31, %v574_v23  ;;  %v759_v33 = vpop.f32.mrf.mxu1 }
 0x4ac   :  { %v3897_v36 = vadd.f32 %v759_v33, %v578_v13  ;;  %v678_v37 = vpop.f32.mrf.mxu0 }
 0x4ad   :  { %v3899_v38 = vadd.f32 %v678_v37, %v570_v21  ;;  %v851_v39 = vpop.f32.mrf.mxu1 }
 0x4ae   :  { %v926_v40 = vadd.f32 %v851_v39, %v3895_v34  ;;  %v680_v41 = vpop.f32.mrf.mxu0 }
 0x4af   :  { %v3902_v42 = vadd.f32 %v680_v41, %v574_v23  ;;  %v853_v46 = vpop.f32.mrf.mxu1 }
 0x4b0   :  { %v2951_v43 = vmul.f32 -1.442695, %v926_v40  ;;  %v922_v45 = vpop.f32.mrf.mxu0  ;;  %v933_v50 = vadd.f32 %v853_v46, %v663_v48 }
 0x4b1   :  { %v940_v58 = vadd.f32 %v922_v45, %v3904_v56 }
 0x4b2   :  { %3348 = vpow2.f32 %v2951_v43  ;;  %v3145_v49 = vpop.f32.mrf.mxu0  ;;  %v2952_v51 = vmul.f32 -1.442695, %v933_v50 }
 0x4b4   :  { %3350 = vpow2.f32 %v2952_v51 }
 0x4bf   :  { %v3349_v52 = vpop.eup %3348 }
 0x4c0   :  { %v930_v53 = vadd.f32 1.0, %v3349_v52 }
 0x4c1   :  { %v3351_v27 = vpop.eup %3350 }
 0x4c2   :  { %3352 = vrcp.f32 %v930_v53  ;;  %v937_v57 = vadd.f32 1.0, %v3351_v27 }
 0x4c4   :  { %3354 = vrcp.f32 %v937_v57 }
 0x4cf   :  { %v3353_v47 = vpop.eup %3352 }
 0x4d0   :  { %v941_v3 = vmul.f32 %v3353_v47, %v940_v58 }
 0x4d1   :  { %v3355_v10 = vpop.eup %3354 }
 0x4d2   :  { %v942_v4 = vadd.f32 %v941_v3, %v750_v62  ;;  %v944_v11 = vsub.f32 1.0, %v3355_v10  ;;  %v946_v14 = vmul.f32 %v3355_v10, %v3848_v8 }
 0x4d4   :  { %3356 = vtanh.f32 %v942_v4 }
 0x4e1   :  { %v3357_v0 = vpop.eup %3356 }
 0x4e2   :  { %v945_v12 = vmul.f32 %v3357_v0, %v944_v11 }
 0x4e4   :  { %v3908_v9 = vadd.f32 %v946_v14, %v945_v12 }
 0x4e6   :  { %2953 = vmatmul.mubr.msk.f32.vlgmr.msra.gmra.mxu1 %vm118_vm0, %v3908_v9  ;;  %3155 = vmatmul.mubr.msk.f32.vlgmr.msra.gmra.mxu0 %vm118_vm0, %v3908_v9  ;;  %v2170_v13 = vsel %vm2169_vm2, %v3908_v9, 0.0  ;;  %v2174_v17 = vmul.f32 %v3908_v9, %v3908_v9  ;;  %v1121_v51 = vrot.slane %v3908_v9, 4 }
 0x4e7   :  { %2171 = vadd.xlane.f32.xlu1 %v2170_v13  ;;  %1154 = vmatpush1.msra.mxu1 %v3805_v54 }
 0x4e8   :  { %3158 = vmatpush3.msra.mxu0 %v3807_v55  ;;  %1155 = vmatprep.subr.mxu1 %v3812_v35  ;;  %v2175_v8 = vsel %vm2169_vm2, %v2174_v17, 0.0 }
 0x4e9   :  { %3159 = vmatprep.subr.mxu0 %v3605_v5  ;;  %1156 = vmatpush1.msra.mxu1 %v3816_v44 }
 0x4ea   :  { %3160 = vmatpush3.msra.mxu0 %v3826_v61  ;;  %1157 = vmatprep.subr.mxu1 %v3819_v59 }
 0x4eb   :  { %2176 = vadd.xlane.f32.xlu1 %v2175_v8  ;;  %3161 = vmatprep.subr.mxu0 %v3605_v5 }
 0x4ec   :  { %1158 = vmatpush1.msra.mxu1 %v3823_v60  ;;  %3162 = vmatpush3.msra.mxu0 %v3842_v7 }
 0x4ed   :  { %1159 = vmatprep.subr.mxu1 %v3830_v63  ;;  %3163 = vmatprep.subr.mxu0 %v3605_v5 }
 0x4ee   :  { %1160 = vmatpush1.msra.mxu1 %v3837_v6  ;;  %1193 = vmatprep.mubr.f32.mxu1 %v3605_v5 }
 0x4ef   :  { %3164 = vmatpush3.msra.mxu0 %v3850_v2  ;;  %3165 = vmatprep.mubr.msk.f32.mxu0 %vm3606_vm1, %v3605_v5 }
 0x4f0   :  { %1320 = vmatprep.subr.mxu1 %v3799_v1  ;;  %3168 = vmatprep.subr.mxu0 %v3605_v5 }
 0x5a6   :  { %v1017_v18 = vpop.f32.mrf.mxu1  ;;  %v1088_v20 = vpop.f32.mrf.mxu0 }
 0x5a7   :  { %v1093_v21 = vrot.slane %v1017_v18, 4  ;;  %v1112_v40 = vadd.f32 %v1088_v20, %v3904_v56 }
 0x5a8   :  { %v1019_v22 = vpop.f32.mrf.mxu1  ;;  %v3156_v23 = vpop.f32.mrf.mxu0 }
 0x5a9   :  { %v1095_v25 = vadd.f32 %v1093_v21, %v3895_v34  ;;  %v1103_v28 = vrot.slane %v1019_v22, 4  ;;  %v1114_v43 = vrot.slane %v1112_v40, 4 }
 0x5ab   :  { %v2955_v16 = vmul.f32 -1.442695, %v1095_v25  ;;  %v1105_v30 = vadd.f32 %v1103_v28, %v663_v48 }
 0x5ad   :  { %3358 = vpow2.f32 %v2955_v16  ;;  %v2956_v31 = vmul.f32 -1.442695, %v1105_v30 }
 0x5af   :  { %3360 = vpow2.f32 %v2956_v31 }
 0x5ba   :  { %v3359_v33 = vpop.eup %3358 }
 0x5bb   :  { %v1099_v37 = vadd.f32 1.0, %v3359_v33 }
 0x5bc   :  { %v3361_v39 = vpop.eup %3360 }
 0x5bd   :  { %3362 = vrcp.f32 %v1099_v37  ;;  %v1109_v41 = vadd.f32 1.0, %v3361_v39 }
 0x5bf   :  { %3364 = vrcp.f32 %v1109_v41 }
 0x5ca   :  { %v3363_v45 = vpop.eup %3362 }
 0x5cb   :  { %v1116_v46 = vmul.f32 %v3363_v45, %v1114_v43 }
 0x5cc   :  { %v3365_v34 = vpop.eup %3364 }
 0x5cd   :  { %v1117_v49 = vadd.f32 %v1116_v46, %v750_v62  ;;  %v1119_v50 = vsub.f32 1.0, %v3365_v34  ;;  %v1123_v53 = vmul.f32 %v3365_v34, %v1121_v51 }
 0x5cf   :  { %3366 = vtanh.f32 %v1117_v49 }
 0x5dc   :  { %v3367_v48 = vpop.eup %3366 }
 0x5dd   :  { %v1120_v52 = vmul.f32 %v3367_v48, %v1119_v50 }
 0x5df   :  { %v3941_v27 = vadd.f32 %v1123_v53, %v1120_v52 }
 0x5e1   :  { %v2263_v57 = vsel %vm2160_vm3, %v3941_v27, 0.0  ;;  %v1126_v58 = vrot.slane %v3941_v27, 4  ;;  %v2267_v47 = vmul.f32 %v3941_v27, %v3941_v27 }
 0x5e2   :  { %2264 = vadd.xlane.f32.xlu0 %v2263_v57 }
 0x5e3   :  { %2957 = vmatmul.mubr.msk.f32.vlgmr.msra.gmra.mxu1 %vm118_vm0, %v1126_v58  ;;  %3166 = vmatmul.mubr.msk.f32.vlgmr.msra.gmra.mxu0 %vm118_vm0, %v1126_v58  ;;  %v2268_v62 = vsel %vm2160_vm3, %v2267_v47, 0.0 }
 0x5e4   :  { %1321 = vmatpush1.msra.mxu1 %v3805_v54  ;;  %3169 = vmatpush3.msra.mxu0 %v3807_v55 }
 0x5e5   :  { %1322 = vmatprep.subr.mxu1 %v3812_v35  ;;  %3170 = vmatprep.subr.mxu0 %v3605_v5 }
 0x5e6   :  { %2269 = vadd.xlane.f32.xlu0 %v2268_v62  ;;  %1323 = vmatpush1.msra.mxu1 %v3816_v44 }
 0x5e7   :  { %3171 = vmatpush3.msra.mxu0 %v3826_v61  ;;  %1324 = vmatprep.subr.mxu1 %v3819_v59 }
 0x5e8   :  { %3172 = vmatprep.subr.mxu0 %v3605_v5  ;;  %1325 = vmatpush1.msra.mxu1 %v3823_v60 }
 0x5e9   :  { %3173 = vmatpush3.msra.mxu0 %v3842_v7  ;;  %1326 = vmatprep.subr.mxu1 %v3830_v63 }
 0x5ea   :  { %3174 = vmatprep.subr.mxu0 %v3605_v5  ;;  %1327 = vmatpush1.msra.mxu1 %v3837_v6 }
 0x5eb   :  { %1360 = vmatprep.mubr.f32.mxu1 %v3605_v5  ;;  %3175 = vmatpush3.msra.mxu0 %v3850_v2 }
 0x5ec   :  { %3176 = vmatprep.mubr.msk.f32.mxu0 %vm3606_vm1, %v3605_v5  ;;  %1498 = vmatprep.subr.mxu1 %v3799_v1 }
 0x5ed   :  { %3179 = vmatprep.subr.mxu0 %v3605_v5 }
 0x6a3   :  { %v1195_v3 = vpop.f32.mrf.mxu1  ;;  %v1266_v4 = vpop.f32.mrf.mxu0 }
 0x6a4   :  { %v1270_v10 = vadd.f32 %v1195_v3, %v3885_v15  ;;  %v1284_v21 = vadd.f32 %v1266_v4, %v3904_v56 }
 0x6a5   :  { %v3167_v11 = vpop.f32.mrf.mxu0  ;;  %v1197_v12 = vpop.f32.mrf.mxu1 }
 0x6a6   :  { %v2959_v0 = vmul.f32 -1.442695, %v1270_v10  ;;  %v1277_v14 = vadd.f32 %v1197_v12, %v3887_v26 }
 0x6a8   :  { %3368 = vpow2.f32 %v2959_v0  ;;  %v2960_v13 = vmul.f32 -1.442695, %v1277_v14 }
 0x6aa   :  { %3370 = vpow2.f32 %v2960_v13 }
 0x6b5   :  { %v3369_v17 = vpop.eup %3368 }
 0x6b6   :  { %v1274_v8 = vadd.f32 1.0, %v3369_v17 }
 0x6b7   :  { %v3371_v18 = vpop.eup %3370 }
 0x6b8   :  { %3372 = vrcp.f32 %v1274_v8  ;;  %v1281_v20 = vadd.f32 1.0, %v3371_v18 }
 0x6ba   :  { %3374 = vrcp.f32 %v1281_v20 }
 0x6c5   :  { %v3373_v22 = vpop.eup %3372 }
 0x6c6   :  { %v1285_v23 = vmul.f32 %v3373_v22, %v1284_v21 }
 0x6c7   :  { %v3375_v16 = vpop.eup %3374 }
 0x6c8   :  { %v1286_v25 = vadd.f32 %v1285_v23, %v3883_v19  ;;  %v1288_v28 = vsub.f32 1.0, %v3375_v16  ;;  %v1291_v33 = vmul.f32 %v3375_v16, %v1126_v58 }
 0x6ca   :  { %3376 = vtanh.f32 %v1286_v25 }
 0x6d7   :  { %v3377_v30 = vpop.eup %3376 }
 0x6d8   :  { %v1289_v31 = vmul.f32 %v3377_v30, %v1288_v28 }
 0x6da   :  { %v3974_v37 = vadd.f32 %v1291_v33, %v1289_v31 }
 0x6dc   :  { %2961 = vmatmul.mubr.msk.f32.vlgmr.msra.gmra.mxu1 %vm118_vm0, %v3974_v37  ;;  %3177 = vmatmul.mubr.msk.f32.vlgmr.msra.gmra.mxu0 %vm118_vm0, %v3974_v37  ;;  %v2356_v39 = vsel %vm2169_vm2, %v3974_v37, 0.0  ;;  %v2360_v40 = vmul.f32 %v3974_v37, %v3974_v37 }
 0x6dd   :  { %2357 = vadd.xlane.f32.xlu1 %v2356_v39  ;;  %1499 = vmatpush1.msra.mxu1 %v3805_v54 }
 0x6de   :  { %3180 = vmatpush3.msra.mxu0 %v3807_v55  ;;  %1500 = vmatprep.subr.mxu1 %v3812_v35  ;;  %v2361_v41 = vsel %vm2169_vm2, %v2360_v40, 0.0 }
 0x6df   :  { %3181 = vmatprep.subr.mxu0 %v3605_v5  ;;  %1501 = vmatpush1.msra.mxu1 %v3816_v44 }
 0x6e0   :  { %3182 = vmatpush3.msra.mxu0 %v3826_v61  ;;  %1502 = vmatprep.subr.mxu1 %v3819_v59 }
 0x6e1   :  { %2362 = vadd.xlane.f32.xlu1 %v2361_v41  ;;  %3183 = vmatprep.subr.mxu0 %v3605_v5 }
 0x6e2   :  { %1503 = vmatpush1.msra.mxu1 %v3823_v60  ;;  %3184 = vmatpush3.msra.mxu0 %v3842_v7 }
 0x6e3   :  { %1504 = vmatprep.subr.mxu1 %v3830_v63  ;;  %3185 = vmatprep.subr.mxu0 %v3605_v5 }
 0x6e4   :  { %1505 = vmatpush1.msra.mxu1 %v3837_v6  ;;  %1538 = vmatprep.mubr.f32.mxu1 %v3605_v5 }
 0x6e5   :  { %3186 = vmatpush3.msra.mxu0 %v3850_v2  ;;  %3187 = vmatprep.mubr.msk.f32.mxu0 %vm3606_vm1, %v3605_v5 }
 0x6e6   :  { %1665 = vmatprep.subr.mxu1 %v3799_v1  ;;  %3190 = vmatprep.subr.mxu0 %v3605_v5 }
 0x79c   :  { %v1362_v43 = vpop.f32.mrf.mxu1  ;;  %v1433_v45 = vpop.f32.mrf.mxu0 }
 0x79d   :  { %v1438_v46 = vrot.slane %v1362_v43, 4  ;;  %v1457_v62 = vadd.f32 %v1433_v45, %v3904_v56 }
 0x79e   :  { %v1364_v49 = vpop.f32.mrf.mxu1  ;;  %v3178_v34 = vpop.f32.mrf.mxu0 }
 0x79f   :  { %v1440_v50 = vadd.f32 %v1438_v46, %v3885_v15  ;;  %v1448_v48 = vrot.slane %v1364_v49, 4  ;;  %v1459_v4 = vrot.slane %v1457_v62, 4 }
 0x7a1   :  { %v2963_v51 = vmul.f32 -1.442695, %v1440_v50  ;;  %v1450_v52 = vadd.f32 %v1448_v48, %v3887_v26  ;;  %v1466_v26 = vrot.slane %v3974_v37, 4 }
 0x7a3   :  { %3378 = vpow2.f32 %v2963_v51  ;;  %v2964_v53 = vmul.f32 -1.442695, %v1450_v52 }
 0x7a5   :  { %3380 = vpow2.f32 %v2964_v53 }
 0x7b0   :  { %v3379_v57 = vpop.eup %3378 }
 0x7b1   :  { %v1444_v58 = vadd.f32 1.0, %v3379_v57 }
 0x7b2   :  { %v3381_v47 = vpop.eup %3380 }
 0x7b3   :  { %3382 = vrcp.f32 %v1444_v58  ;;  %v1454_v3 = vadd.f32 1.0, %v3381_v47 }
 0x7b5   :  { %3384 = vrcp.f32 %v1454_v3 }
 0x7c0   :  { %v3383_v10 = vpop.eup %3382 }
 0x7c1   :  { %v1461_v11 = vmul.f32 %v3383_v10, %v1459_v4 }
 0x7c2   :  { %v3385_v0 = vpop.eup %3384 }
 0x7c3   :  { %v1462_v15 = vadd.f32 %v1461_v11, %v3883_v19  ;;  %v1464_v12 = vsub.f32 1.0, %v3385_v0  ;;  %v1468_v17 = vmul.f32 %v3385_v0, %v1466_v26 }
 0x7c5   :  { %3386 = vtanh.f32 %v1462_v15 }
 0x7d2   :  { %v3387_v14 = vpop.eup %3386 }
 0x7d3   :  { %v1465_v13 = vmul.f32 %v3387_v14, %v1464_v12 }
 0x7d5   :  { %v4009_v8 = vadd.f32 %v1468_v17, %v1465_v13 }
 0x7d7   :  { %v2448_v18 = vsel %vm2160_vm3, %v4009_v8, 0.0  ;;  %v1471_v20 = vrot.slane %v4009_v8, 4  ;;  %v2452_v21 = vmul.f32 %v4009_v8, %v4009_v8 }
 0x7d8   :  { %2449 = vadd.xlane.f32.xlu0 %v2448_v18 }
 0x7d9   :  { %2965 = vmatmul.mubr.msk.f32.vlgmr.msra.gmra.mxu1 %vm118_vm0, %v1471_v20  ;;  %3188 = vmatmul.mubr.msk.f32.vlgmr.msra.gmra.mxu0 %vm118_vm0, %v1471_v20  ;;  %v2453_v19 = vsel %vm2160_vm3, %v2452_v21, 0.0 }
 0x7da   :  { %1666 = vmatpush1.msra.mxu1 %v3805_v54  ;;  %3191 = vmatpush3.msra.mxu0 %v3807_v55 }
 0x7db   :  { %1667 = vmatprep.subr.mxu1 %v3812_v35  ;;  %3192 = vmatprep.subr.mxu0 %v3605_v5 }
 0x7dc   :  { %2454 = vadd.xlane.f32.xlu0 %v2453_v19  ;;  %1668 = vmatpush1.msra.mxu1 %v3816_v44 }
 0x7dd   :  { %3193 = vmatpush3.msra.mxu0 %v3826_v61  ;;  %1669 = vmatprep.subr.mxu1 %v3819_v59 }
 0x7de   :  { %3194 = vmatprep.subr.mxu0 %v3605_v5  ;;  %1670 = vmatpush1.msra.mxu1 %v3823_v60 }
 0x7df   :  { %3195 = vmatpush3.msra.mxu0 %v3842_v7  ;;  %1671 = vmatprep.subr.mxu1 %v3830_v63 }
 0x7e0   :  { %3196 = vmatprep.subr.mxu0 %v3605_v5  ;;  %1672 = vmatpush1.msra.mxu1 %v3837_v6 }
 0x7e1   :  { %1705 = vmatprep.mubr.f32.mxu1 %v3605_v5  ;;  %3197 = vmatpush3.msra.mxu0 %v3850_v2 }
 0x7e2   :  { %3198 = vmatprep.mubr.msk.f32.mxu0 %vm3606_vm1, %v3605_v5  ;;  %1843 = vmatprep.subr.mxu1 %v3799_v1 }
 0x7e3   :  { %3201 = vmatprep.subr.mxu0 %v3605_v5 }
 0x899   :  { %v1540_v22 = vpop.f32.mrf.mxu1  ;;  %v1611_v23 = vpop.f32.mrf.mxu0 }
 0x89a   :  { %v1615_v25 = vadd.f32 %v1540_v22, %v3889_v29  ;;  %v1629_v45 = vadd.f32 %v1611_v23, %v3904_v56 }
 0x89b   :  { %v3189_v16 = vpop.f32.mrf.mxu0  ;;  %v1542_v30 = vpop.f32.mrf.mxu1 }
 0x89c   :  { %v2967_v28 = vmul.f32 -1.442695, %v1615_v25  ;;  %v1622_v31 = vadd.f32 %v1542_v30, %v3893_v32 }
 0x89e   :  { %3388 = vpow2.f32 %v2967_v28  ;;  %v2968_v33 = vmul.f32 -1.442695, %v1622_v31 }
 0x8a0   :  { %3390 = vpow2.f32 %v2968_v33 }
 0x8ab   :  { %v3389_v39 = vpop.eup %3388 }
 0x8ac   :  { %v1619_v40 = vadd.f32 1.0, %v3389_v39 }
 0x8ad   :  { %v3391_v41 = vpop.eup %3390 }
 0x8ae   :  { %3392 = vrcp.f32 %v1619_v40  ;;  %v1626_v43 = vadd.f32 1.0, %v3391_v41 }
 0x8b0   :  { %3394 = vrcp.f32 %v1626_v43 }
 0x8bb   :  { %v3393_v46 = vpop.eup %3392 }
 0x8bc   :  { %v1630_v49 = vmul.f32 %v3393_v46, %v1629_v45 }
 0x8bd   :  { %v3395_v50 = vpop.eup %3394 }
 0x8be   :  { %v1631_v34 = vadd.f32 %v1630_v49, %v3897_v36  ;;  %v1633_v51 = vsub.f32 1.0, %v3395_v50  ;;  %v1636_v53 = vmul.f32 %v3395_v50, %v1471_v20 }
 0x8c0   :  { %3396 = vtanh.f32 %v1631_v34 }
 0x8cd   :  { %v3397_v48 = vpop.eup %3396 }
 0x8ce   :  { %v1634_v52 = vmul.f32 %v3397_v48, %v1633_v51 }
 0x8d0   :  { %v4042_v57 = vadd.f32 %v1636_v53, %v1634_v52 }
 0x8d2   :  { %2969 = vmatmul.mubr.msk.f32.vlgmr.msra.gmra.mxu1 %vm118_vm0, %v4042_v57  ;;  %3199 = vmatmul.mubr.msk.f32.vlgmr.msra.gmra.mxu0 %vm118_vm0, %v4042_v57  ;;  %v2541_v58 = vsel %vm2169_vm2, %v4042_v57, 0.0  ;;  %v2545_v47 = vmul.f32 %v4042_v57, %v4042_v57 }
 0x8d3   :  { %2542 = vadd.xlane.f32.xlu1 %v2541_v58  ;;  %1844 = vmatpush1.msra.mxu1 %v3805_v54 }
 0x8d4   :  { %3202 = vmatpush3.msra.mxu0 %v3807_v55  ;;  %1845 = vmatprep.subr.mxu1 %v3812_v35  ;;  %v2546_v62 = vsel %vm2169_vm2, %v2545_v47, 0.0 }
 0x8d5   :  { %3203 = vmatprep.subr.mxu0 %v3605_v5  ;;  %1846 = vmatpush1.msra.mxu1 %v3816_v44 }
 0x8d6   :  { %3204 = vmatpush3.msra.mxu0 %v3826_v61  ;;  %1847 = vmatprep.subr.mxu1 %v3819_v59 }
 0x8d7   :  { %2547 = vadd.xlane.f32.xlu1 %v2546_v62  ;;  %3205 = vmatprep.subr.mxu0 %v3605_v5 }
 0x8d8   :  { %1848 = vmatpush1.msra.mxu1 %v3823_v60  ;;  %3206 = vmatpush3.msra.mxu0 %v3842_v7 }
 0x8d9   :  { %1849 = vmatprep.subr.mxu1 %v3830_v63  ;;  %3207 = vmatprep.subr.mxu0 %v3605_v5 }
 0x8da   :  { %1850 = vmatpush1.msra.mxu1 %v3837_v6  ;;  %1883 = vmatprep.mubr.f32.mxu1 %v3605_v5 }
 0x8db   :  { %3208 = vmatpush3.msra.mxu0 %v3850_v2  ;;  %3209 = vmatprep.mubr.msk.f32.mxu0 %vm3606_vm1, %v3605_v5 }
 0x8dc   :  { %2010 = vmatprep.subr.mxu1 %v3799_v1  ;;  %3212 = vmatprep.subr.mxu0 %v3605_v5 }
 0x992   :  { %v1707_v3 = vpop.f32.mrf.mxu1  ;;  %v1778_v4 = vpop.f32.mrf.mxu0 }
 0x993   :  { %v1783_v10 = vrot.slane %v1707_v3, 4  ;;  %v1802_v20 = vadd.f32 %v1778_v4, %v3904_v56 }
 0x994   :  { %v1709_v11 = vpop.f32.mrf.mxu1  ;;  %v3200_v15 = vpop.f32.mrf.mxu0 }
 0x995   :  { %v1785_v0 = vadd.f32 %v1783_v10, %v3889_v29  ;;  %v1793_v26 = vrot.slane %v1709_v11, 4  ;;  %v1804_v19 = vrot.slane %v1802_v20, 4 }
 0x997   :  { %v2971_v12 = vmul.f32 -1.442695, %v1785_v0  ;;  %v1795_v14 = vadd.f32 %v1793_v26, %v3893_v32  ;;  %v1811_v32 = vrot.slane %v4042_v57, 4 }
 0x999   :  { %3398 = vpow2.f32 %v2971_v12  ;;  %v2972_v13 = vmul.f32 -1.442695, %v1795_v14 }
 0x99b   :  { %3400 = vpow2.f32 %v2972_v13 }
 0x9a6   :  { %v3399_v17 = vpop.eup %3398 }
 0x9a7   :  { %v1789_v18 = vadd.f32 1.0, %v3399_v17 }
 0x9a8   :  { %v3401_v1 = vpop.eup %3400 }
 0x9a9   :  { %3402 = vrcp.f32 %v1789_v18  ;;  %v1799_v21 = vadd.f32 1.0, %v3401_v1 }
 0x9ab   :  { %3404 = vrcp.f32 %v1799_v21 }
 0x9b6   :  { %v3403_v22 = vpop.eup %3402 }
 0x9b7   :  { %v1806_v23 = vmul.f32 %v3403_v22, %v1804_v19 }
 0x9b8   :  { %v3405_v25 = vpop.eup %3404 }
 0x9b9   :  { %v1807_v29 = vadd.f32 %v1806_v23, %v3897_v36  ;;  %v1809_v16 = vsub.f32 1.0, %v3405_v25  ;;  %v1813_v31 = vmul.f32 %v3405_v25, %v1811_v32 }
 0x9bb   :  { %3406 = vtanh.f32 %v1807_v29 }
 0x9c8   :  { %v3407_v28 = vpop.eup %3406 }
 0x9c9   :  { %v1810_v30 = vmul.f32 %v3407_v28, %v1809_v16 }
 0x9cb   :  { %v4077_v33 = vadd.f32 %v1813_v31, %v1810_v30 }
 0x9cd   :  { %v2633_v39 = vsel %vm2160_vm3, %v4077_v33, 0.0  ;;  %v4082_v40 = vrot.slane %v4077_v33, 4  ;;  %v2637_v41 = vmul.f32 %v4077_v33, %v4077_v33 }
 0x9ce   :  { %2634 = vadd.xlane.f32.xlu0 %v2633_v39 }
 0x9cf   :  { %2973 = vmatmul.mubr.msk.f32.vlgmr.msra.gmra.mxu1 %vm118_vm0, %v4082_v40  ;;  %3210 = vmatmul.mubr.msk.f32.vlgmr.msra.gmra.mxu0 %vm118_vm0, %v4082_v40  ;;  %v2638_v36 = vsel %vm2160_vm3, %v2637_v41, 0.0 }
 0x9d0   :  { %2011 = vmatpush1.msra.mxu1 %v3805_v54  ;;  %3213 = vmatpush3.msra.mxu0 %v3807_v55 }
 0x9d1   :  { %2012 = vmatprep.subr.mxu1 %v3812_v35  ;;  %3214 = vmatprep.subr.mxu0 %v3605_v5 }
 0x9d2   :  { %2639 = vadd.xlane.f32.xlu0 %v2638_v36  ;;  %2013 = vmatpush1.msra.mxu1 %v3816_v44 }
 0x9d3   :  { %3215 = vmatpush3.msra.mxu0 %v3826_v61  ;;  %2014 = vmatprep.subr.mxu1 %v3819_v59 }
 0x9d4   :  { %3216 = vmatprep.subr.mxu0 %v3605_v5  ;;  %2015 = vmatpush1.msra.mxu1 %v3823_v60 }
 0x9d5   :  { %3217 = vmatpush3.msra.mxu0 %v3842_v7  ;;  %2016 = vmatprep.subr.mxu1 %v3830_v63  ;;  %v2265_v63 = vpop.xlane.xlu0 %2264  ;;  %v2172_v7 = vpop.xlane.xlu1 %2171 }
 0x9d6   :  { %3218 = vmatprep.subr.mxu0 %v3605_v5  ;;  %2017 = vmatpush1.msra.mxu1 %v3837_v6  ;;  %v2266_v45 = vmul.f32 0.03125, %v2265_v63  ;;  %v4112_v50 = vmul.f32 0.03125, %v2172_v7 }
 0x9d7   :  { %3219 = vmatpush3.msra.mxu0 %v3850_v2  ;;  %2050 = vmatprep.mubr.f32.mxu1 %v3605_v5 }
 0x9d8   :  { %3220 = vmatprep.mubr.msk.f32.mxu0 %vm3606_vm1, %v3605_v5  ;;  %3223 = vmatprep.subr.mxu1 %v3605_v5  ;;  %v2272_v51 = vmul.f32 %v2266_v45, %v2266_v45  ;;  %v2179_v58 = vmul.f32 %v4112_v50, %v4112_v50 }
 0x9d9   :  { %3234 = vmatprep.subr.mxu0 %v3605_v5  ;;  %v2270_v2 = vpop.xlane.xlu0 %2269  ;;  %v2177_v34 = vpop.xlane.xlu1 %2176 }
 0x9da   :  { %v2271_v49 = vmul.f32 0.03125, %v2270_v2  ;;  %v2178_v52 = vmul.f32 0.03125, %v2177_v34  ;;  %v2275_v2 = vsub.f32 %v3941_v27, %v2266_v45  ;;  %v4145_v27 = vld [vmem:[#allocation5 + $0x18] ss:$0 sm:$0xff] }
 0x9dc   :  { %v2273_v53 = vsub.f32 %v2271_v49, %v2272_v51  ;;  %v2180_v3 = vsub.f32 %v2178_v52, %v2179_v58  ;;  %v2182_v58 = vsub.f32 %v3908_v9, %v4112_v50 }
 0x9dd   :  { %v2450_v48 = vpop.xlane.xlu0 %2449  ;;  %v2358_v47 = vpop.xlane.xlu1 %2357 }
 0x9de   :  { %v2274_v4 = vmax.f32 %v2273_v53, 0.0  ;;  %v4116_v11 = vmul.f32 0.03125, %v2450_v48  ;;  %v2181_v12 = vmax.f32 %v2180_v3, 0.0  ;;  %v4118_v17 = vmul.f32 0.03125, %v2358_v47 }
 0x9e0   :  { %v2276_v26 = vadd.f32 1e-05, %v2274_v4  ;;  %v2457_v18 = vmul.f32 %v4116_v11, %v4116_v11  ;;  %v2183_v23 = vadd.f32 1e-05, %v2181_v12  ;;  %v2365_v25 = vmul.f32 %v4118_v17, %v4118_v17 }
 0x9e1   :  { %v2455_v10 = vpop.xlane.xlu0 %2454  ;;  %v2363_v14 = vpop.xlane.xlu1 %2362  ;;  %v2460_v12 = vsub.f32 %v4009_v8, %v4116_v11 }
 0x9e2   :  { %v2456_v15 = vmul.f32 0.03125, %v2455_v10  ;;  %v2364_v21 = vmul.f32 0.03125, %v2363_v14  ;;  %v4167_v10 = vld [vmem:[%s4343_s7 + $0x8] sm:$0xff] }
 0x9e4   :  { %v2458_v19 = vsub.f32 %v2456_v15, %v2457_v18  ;;  %v2366_v28 = vsub.f32 %v2364_v21, %v2365_v25  ;;  %v4185_v18 = vld [vmem:[%s4343_s7] sm:$0xff] }
 0x9e5   :  { %v2543_v29 = vpop.xlane.xlu1 %2542 }
 0x9e6   :  { %v2459_v30 = vmax.f32 %v2458_v19, 0.0  ;;  %v2367_v41 = vmax.f32 %v2366_v28, 0.0 }
 0x9e8   :  { %v2461_v36 = vadd.f32 1e-05, %v2459_v30 }
 0x9e9   :  { %v2548_v39 = vpop.xlane.xlu1 %2547 }
 0xa57   :  { %v2635_v13 = vpop.xlane.xlu0 %2634 }
 0xa58   :  { %v4126_v31 = vmul.f32 0.03125, %v2635_v13 }
 0xa5b   :  { %v2640_v32 = vpop.xlane.xlu0 %2639 }
 0xa8f   :  { %v1885_v54 = vpop.f32.mrf.mxu1  ;;  %v1956_v55 = vpop.f32.mrf.mxu0 }
 0xa90   :  { %v1960_v35 = vadd.f32 %v1885_v54, %v3899_v38  ;;  %v1974_v1 = vadd.f32 %v1956_v55, %v3904_v56  ;;  %v2641_v56 = vmul.f32 0.03125, %v2640_v32  ;;  %v4128_v54 = vmul.f32 0.03125, %v2543_v29 }
 0xa91   :  { %v3211_v44 = vpop.f32.mrf.mxu0  ;;  %v1887_v60 = vpop.f32.mrf.mxu1  ;;  %v2642_v55 = vmul.f32 %v4126_v31, %v4126_v31 }
 0xa92   :  { %v2975_v59 = vmul.f32 -1.442695, %v1960_v35  ;;  %v1967_v61 = vadd.f32 %v1887_v60, %v3902_v42  ;;  %v2549_v35 = vmul.f32 0.03125, %v2548_v39  ;;  %v2550_v60 = vmul.f32 %v4128_v54, %v4128_v54 }
 0xa93   :  { %v2643_v44 = vsub.f32 %v2641_v56, %v2642_v55 }
 0xa94   :  { %3408 = vpow2.f32 %v2975_v59  ;;  %v2976_v6 = vmul.f32 -1.442695, %v1967_v61  ;;  %v2369_v59 = vadd.f32 1e-05, %v2367_v41 }
 0xa95   :  { %v2644_v7 = vmax.f32 %v2643_v44, 0.0 }
 0xa96   :  { %3410 = vpow2.f32 %v2976_v6  ;;  %v2551_v6 = vsub.f32 %v2549_v35, %v2550_v60 }
 0xa97   :  { %v2646_v48 = vadd.f32 1e-05, %v2644_v7 }
 0xa98   :  { %v2552_v51 = vmax.f32 %v2551_v6, 0.0 }
 0xa9a   :  { %v2554_v3 = vadd.f32 1e-05, %v2552_v51 }
 0xaa1   :  { %v3409_v43 = vpop.eup %3408 }
 0xaa2   :  { %v1964_v46 = vadd.f32 1.0, %v3409_v43 }
 0xaa3   :  { %v3411_v62 = vpop.eup %3410 }
 0xaa4   :  { %3412 = vrcp.f32 %v1964_v46  ;;  %v1971_v0 = vadd.f32 1.0, %v3411_v62  ;;  %v4143_v62 = vld [vmem:[%s4343_s7 + $0x18] sm:$0xff] }
 0xaa6   :  { %3414 = vrcp.f32 %v1971_v0  ;;  %v4171_v0 = vld [vmem:[#allocation5 + $0x19] ss:$0 sm:$0xff] }
 0xaa7   :  { %3416 = vrsqrt.f32 %v2276_v26 }
 0xab1   :  { %v3413_v20 = vpop.eup %3412 }
 0xab2   :  { %v1975_v22 = vmul.f32 %v3413_v20, %v1974_v1  ;;  %v2368_v1 = vsub.f32 %v3974_v37, %v4118_v17 }
 0xab3   :  { %v3415_v61 = vpop.eup %3414 }
 0xab4   :  { %v1976_v16 = vadd.f32 %v1975_v22, %v3891_v24  ;;  %v3417_v63 = vpop.eup %3416  ;;  %v1978_v43 = vsub.f32 1.0, %v3415_v61  ;;  %v1981_v53 = vmul.f32 %v3415_v61, %v4082_v40  ;;  %v4156_v40 = vld [vmem:[%s4343_s7 + $0x10] sm:$0xff]  ;;  %v2645_v22 = vsub.f32 %v4077_v33, %v4126_v31 }
 0xab5   :  { %v2278_v49 = vmul.f32 %v3417_v63, %v2275_v2  ;;  %v2553_v33 = vsub.f32 %v4042_v57, %v4128_v54 }
 0xab6   :  { %3418 = vtanh.f32 %v1976_v16 }
 0xab7   :  { %3420 = vrsqrt.f32 %v2183_v23  ;;  %v2279_v50 = vmul.f32 %v2278_v49, %v4145_v27 }
 0xab8   :  { %3422 = vrsqrt.f32 %v2461_v36 }
 0xab9   :  { %3424 = vrsqrt.f32 %v2369_v59  ;;  %v2280_v14 = vadd.f32 %v2279_v50, %v4171_v0 }
 0xaba   :  { %3426 = vrsqrt.f32 %v2646_v48 }
 0xabb   :  { %3428 = vrsqrt.f32 %v2554_v3  ;;  %v2282_v21 = vrot.slane %v2280_v14, 4 }
 0xac3   :  { %v3419_v46 = vpop.eup %3418 }
 0xac4   :  { %v3421_v34 = vpop.eup %3420  ;;  %v1979_v52 = vmul.f32 %v3419_v46, %v1978_v43 }
 0xac5   :  { %v2185_v45 = vmul.f32 %v3421_v34, %v2182_v58  ;;  %v3423_v15 = vpop.eup %3422  ;;  %v4282_v58 = vld [vmem:[#allocation5 + $0x1a] ss:$0 sm:$0xff] }
 0xac6   :  { %v4138_v47 = vadd.f32 %v1981_v53, %v1979_v52  ;;  %v2463_v8 = vmul.f32 %v3423_v15, %v2460_v12  ;;  %v3425_v11 = vpop.eup %3424 }
 0xac7   :  { %v2186_v26 = vmul.f32 %v2185_v45, %v4145_v27  ;;  %v2371_v19 = vmul.f32 %v3425_v11, %v2368_v1  ;;  %v3427_v17 = vpop.eup %3426 }
 0xac8   :  { %2977 = vmatmul.mubr.msk.f32.vlgmr.msra.gmra.mxu1 %vm118_vm0, %v4138_v47  ;;  %3221 = vmatmul.mubr.msk.f32.vlgmr.msra.gmra.mxu0 %vm118_vm0, %v4138_v47  ;;  %v2726_v9 = vsel %vm2169_vm2, %v4138_v47, 0.0  ;;  %v2730_v4 = vmul.f32 %v4138_v47, %v4138_v47  ;;  %v2464_v37 = vmul.f32 %v2463_v8, %v4145_v27  ;;  %v2648_v25 = vmul.f32 %v3427_v17, %v2645_v22  ;;  %v3429_v16 = vpop.eup %3428 }
 0xac9   :  { %3224 = vmatpush3.msra.mxu1 %v4143_v62  ;;  %3235 = vmatpush3.msra.mxu0 %v4143_v62  ;;  %v2187_v20 = vadd.f32 %v2186_v26, %v4171_v0  ;;  %v2372_v23 = vmul.f32 %v2371_v19, %v4145_v27  ;;  %v2556_v30 = vmul.f32 %v3429_v16, %v2553_v33 }
 0xaca   :  { %2727 = vadd.xlane.f32.xlu1 %v2726_v9  ;;  %3225 = vmatprep.subr.mxu1 %v3605_v5  ;;  %v2731_v13 = vsel %vm2169_vm2, %v2730_v4, 0.0  ;;  %v2465_v29 = vadd.f32 %v2464_v37, %v4171_v0  ;;  %v2649_v57 = vmul.f32 %v2648_v25, %v4145_v27 }
 0xacb   :  { %3236 = vmatprep.subr.mxu0 %v3605_v5  ;;  %3226 = vmatpush3.msra.mxu1 %v4156_v40  ;;  %v2373_v32 = vadd.f32 %v2372_v23, %v4171_v0  ;;  %v2557_v31 = vmul.f32 %v2556_v30, %v4145_v27  ;;  %v2156_v30 = vrot.slane %v4138_v47, 4 }
 0xacc   :  { %3237 = vmatpush3.msra.mxu0 %v4156_v40  ;;  %3227 = vmatprep.subr.mxu1 %v3605_v5  ;;  %v2467_v28 = vrot.slane %v2465_v29, 4  ;;  %v2650_v56 = vadd.f32 %v2649_v57, %v4171_v0 }
 0xacd   :  { %3238 = vmatprep.subr.mxu0 %v3605_v5  ;;  %3228 = vmatpush3.msra.mxu1 %v4167_v10  ;;  %v2558_v39 = vadd.f32 %v2557_v31, %v4171_v0 }
 0xace   :  { %3239 = vmatpush3.msra.mxu0 %v4167_v10  ;;  %2732 = vadd.xlane.f32.xlu1 %v2731_v13  ;;  %v2652_v41 = vrot.slane %v2650_v56, 4 }
 0xacf   :  { %3229 = vmatprep.subr.mxu1 %v3605_v5  ;;  %3240 = vmatprep.subr.mxu0 %v3605_v5 }
 0xad0   :  { %3230 = vmatpush3.msra.mxu1 %v4185_v18  ;;  %3231 = vmatprep.mubr.msk.f32.mxu1 %vm3606_vm1, %v3605_v5 }
 0xad1   :  { %3241 = vmatpush3.msra.mxu0 %v4185_v18  ;;  %3242 = vmatprep.mubr.msk.f32.mxu0 %vm3606_vm1, %v3605_v5 }
 0xad2   :  { %3232 = vmatmul.mubr.msk.f32.vlgmr.msra.gmra.mxu1 %vm118_vm0, %v2187_v20  ;;  %3243 = vmatmul.mubr.msk.f32.vlgmr.msra.gmra.mxu0 %vm118_vm0, %v2282_v21  ;;  %v3444_v20 = vld [vmem:[#allocation5 + $0x1c] ss:$0 sm:$0xff] }
 0xad3   :  { %3245 = vmatprep.subr.mxu1 %v3605_v5  ;;  %3256 = vmatprep.subr.mxu0 %v3605_v5 }
 0xad4   :  { %3246 = vmatpush3.msra.mxu1 %v4143_v62  ;;  %3257 = vmatpush3.msra.mxu0 %v4143_v62 }
 0xad5   :  { %3247 = vmatprep.subr.mxu1 %v3605_v5  ;;  %3258 = vmatprep.subr.mxu0 %v3605_v5 }
 0xad6   :  { %3248 = vmatpush3.msra.mxu1 %v4156_v40  ;;  %3259 = vmatpush3.msra.mxu0 %v4156_v40 }
 0xad7   :  { %3249 = vmatprep.subr.mxu1 %v3605_v5  ;;  %3260 = vmatprep.subr.mxu0 %v3605_v5 }
 0xad8   :  { %3250 = vmatpush3.msra.mxu1 %v4167_v10  ;;  %3261 = vmatpush3.msra.mxu0 %v4167_v10 }
 0xad9   :  { %3251 = vmatprep.subr.mxu1 %v3605_v5  ;;  %3262 = vmatprep.subr.mxu0 %v3605_v5 }
 0xada   :  { %3252 = vmatpush3.msra.mxu1 %v4185_v18  ;;  %3253 = vmatprep.mubr.msk.f32.mxu1 %vm3606_vm1, %v3605_v5 }
 0xadb   :  { %3263 = vmatpush3.msra.mxu0 %v4185_v18  ;;  %3264 = vmatprep.mubr.msk.f32.mxu0 %vm3606_vm1, %v3605_v5 }
 0xadc   :  { %3254 = vmatmul.mubr.msk.f32.vlgmr.msra.gmra.mxu1 %vm118_vm0, %v2373_v32  ;;  %3265 = vmatmul.mubr.msk.f32.vlgmr.msra.gmra.mxu0 %vm118_vm0, %v2467_v28 }
 0xadd   :  { %3267 = vmatprep.subr.mxu1 %v3605_v5  ;;  %3278 = vmatprep.subr.mxu0 %v3605_v5 }
 0xade   :  { %3268 = vmatpush3.msra.mxu1 %v4143_v62  ;;  %3279 = vmatpush3.msra.mxu0 %v4143_v62 }
 0xadf   :  { %3269 = vmatprep.subr.mxu1 %v3605_v5  ;;  %3280 = vmatprep.subr.mxu0 %v3605_v5 }
 0xae0   :  { %3270 = vmatpush3.msra.mxu1 %v4156_v40  ;;  %3281 = vmatpush3.msra.mxu0 %v4156_v40 }
 0xae1   :  { %3271 = vmatprep.subr.mxu1 %v3605_v5  ;;  %3282 = vmatprep.subr.mxu0 %v3605_v5 }
 0xae2   :  { %3272 = vmatpush3.msra.mxu1 %v4167_v10  ;;  %3283 = vmatpush3.msra.mxu0 %v4167_v10 }
 0xae3   :  { %3273 = vmatprep.subr.mxu1 %v3605_v5  ;;  %3284 = vmatprep.subr.mxu0 %v3605_v5 }
 0xae4   :  { %3274 = vmatpush3.msra.mxu1 %v4185_v18  ;;  %3275 = vmatprep.mubr.msk.f32.mxu1 %vm3606_vm1, %v3605_v5 }
 0xae5   :  { %3285 = vmatpush3.msra.mxu0 %v4185_v18  ;;  %3286 = vmatprep.mubr.msk.f32.mxu0 %vm3606_vm1, %v3605_v5 }
 0xae6   :  { %3276 = vmatmul.mubr.msk.f32.vlgmr.msra.gmra.mxu1 %vm118_vm0, %v2558_v39  ;;  %3287 = vmatmul.mubr.msk.f32.vlgmr.msra.gmra.mxu0 %vm118_vm0, %v2652_v41 }
 0xae7   :  { %3289 = vmatprep.subr.mxu1 %v3605_v5  ;;  %3297 = vmatprep.mubr.msk.f32.mxu1 %vm3606_vm1, %v3605_v5 }
 0xae8   :  { %3290 = vmatpush3.msra.mxu1 %v4143_v62  ;;  %3300 = vmatprep.subr.mxu0 %v3605_v5 }
 0xae9   :  { %3291 = vmatprep.subr.mxu1 %v3605_v5  ;;  %3301 = vmatpush3.msra.mxu0 %v4143_v62 }
 0xaea   :  { %3292 = vmatpush3.msra.mxu1 %v4156_v40  ;;  %3302 = vmatprep.subr.mxu0 %v3605_v5 }
 0xaeb   :  { %3293 = vmatprep.subr.mxu1 %v3605_v5  ;;  %3303 = vmatpush3.msra.mxu0 %v4156_v40 }
 0xaec   :  { %3294 = vmatpush3.msra.mxu1 %v4167_v10  ;;  %3304 = vmatprep.subr.mxu0 %v3605_v5 }
 0xaed   :  { %3295 = vmatprep.subr.mxu1 %v3605_v5  ;;  %3305 = vmatpush3.msra.mxu0 %v4167_v10 }
 0xaee   :  { %3296 = vmatpush3.msra.mxu1 %v4185_v18  ;;  %3306 = vmatprep.subr.mxu0 %v3605_v5 }
 0xaef   :  { %3307 = vmatpush3.msra.mxu0 %v4185_v18  ;;  %3308 = vmatprep.mubr.msk.f32.mxu0 %vm3606_vm1, %v3605_v5 }
 0xb53   :  { %v2728_v36 = vpop.xlane.xlu1 %2727 }
 0xb54   :  { %v2729_v54 = vmul.f32 0.03125, %v2728_v36 }
 0xb56   :  { %v2735_v35 = vmul.f32 %v2729_v54, %v2729_v54  ;;  %v2738_v63 = vsub.f32 %v4138_v47, %v2729_v54 }
 0xb57   :  { %v2733_v55 = vpop.xlane.xlu1 %2732 }
 0xb58   :  { %v2734_v44 = vmul.f32 0.03125, %v2733_v55 }
 0xb5a   :  { %v2736_v59 = vsub.f32 %v2734_v44, %v2735_v35 }
 0xb5c   :  { %v2737_v60 = vmax.f32 %v2736_v59, 0.0 }
 0xb5e   :  { %v2739_v61 = vadd.f32 1e-05, %v2737_v60 }
 0xb60   :  { %3430 = vrsqrt.f32 %v2739_v61 }
 0xb6d   :  { %v3431_v6 = vpop.eup %3430 }
 0xb6e   :  { %v2741_v7 = vmul.f32 %v3431_v6, %v2738_v63 }
 0xb70   :  { %v2742_v2 = vmul.f32 %v2741_v7, %v4145_v27 }
 0xb72   :  { %v2743_v43 = vadd.f32 %v2742_v2, %v4171_v0 }
 0xb74   :  { %3298 = vmatmul.mubr.msk.f32.vlgmr.msra.gmra.mxu1 %vm118_vm0, %v2743_v43 }
 0xb88   :  { %v2052_v5 = vpop.f32.mrf.mxu1  ;;  %v2123_v46 = vpop.f32.mrf.mxu0 }
 0xb89   :  { %v2128_v49 = vrot.slane %v2052_v5, 4  ;;  %v2147_v21 = vadd.f32 %v3444_v20, %v2123_v46 }
 0xb8a   :  { %v2054_v34 = vpop.f32.mrf.mxu1  ;;  %v3222_v51 = vpop.f32.mrf.mxu0 }
 0xb8b   :  { %v2130_v48 = vadd.f32 %v2128_v49, %v3899_v38  ;;  %v2138_v53 = vrot.slane %v2054_v34, 4  ;;  %v2149_v29 = vrot.slane %v2147_v21, 4 }
 0xb8d   :  { %v2979_v52 = vmul.f32 -1.442695, %v2130_v48  ;;  %v2140_v62 = vadd.f32 %v2138_v53, %v3902_v42 }
 0xb8f   :  { %3432 = vpow2.f32 %v2979_v52  ;;  %v2980_v10 = vmul.f32 -1.442695, %v2140_v62 }
 0xb91   :  { %3434 = vpow2.f32 %v2980_v10 }
 0xb92   :  { %v2257_v45 = vpop.f32.mrf.mxu1  ;;  %v2351_v3 = vpop.f32.mrf.mxu0 }
 0xb93   :  { %v2258_v9 = vadd.f32 %v2257_v45, %v4282_v58  ;;  %v2352_v40 = vadd.f32 %v2351_v3, %v4282_v58 }
 0xb94   :  { %v3233_v50 = vpop.f32.mrf.mxu1  ;;  %v3244_v4 = vpop.f32.mrf.mxu0 }
 0xb95   :  { %2262 = vst.msk [vmem:[%s4344_s8] sm:$0xf] %vm2261_vm4, %v2258_v9  ;;  %2355 = vst.msk [vmem:[%s4344_s8 + $0x4] sm:$0xf] %vm2261_vm4, %v2352_v40 }
 0xb9c   :  { %v3433_v38 = vpop.eup %3432  ;;  %v2443_v42 = vpop.f32.mrf.mxu1 }
 0xb9d   :  { %v2536_v15 = vpop.f32.mrf.mxu0  ;;  %v2134_v12 = vadd.f32 1.0, %v3433_v38  ;;  %v2444_v26 = vadd.f32 %v2443_v42, %v4282_v58 }
 0xb9e   :  { %v2537_v14 = vadd.f32 %v2536_v15, %v4282_v58  ;;  %v3255_v13 = vpop.f32.mrf.mxu1  ;;  %v3435_v8 = vpop.eup %3434 }
 0xb9f   :  { %v3266_v18 = vpop.f32.mrf.mxu0  ;;  %3436 = vrcp.f32 %v2134_v12  ;;  %2447 = vst.msk [vmem:[%s4344_s8 + $0x8] sm:$0xf] %vm2261_vm4, %v2444_v26  ;;  %v2144_v23 = vadd.f32 1.0, %v3435_v8 }
 0xba0   :  { %2540 = vst.msk [vmem:[%s4344_s8 + $0xc] sm:$0xf] %vm2261_vm4, %v2537_v14 }
 0xba1   :  { %3438 = vrcp.f32 %v2144_v23 }
 0xba6   :  { %v2628_v11 = vpop.f32.mrf.mxu1  ;;  %v2721_v1 = vpop.f32.mrf.mxu0 }
 0xba7   :  { %v2629_v19 = vadd.f32 %v2628_v11, %v4282_v58  ;;  %v2722_v37 = vadd.f32 %v2721_v1, %v4282_v58 }
 0xba8   :  { %v3277_v17 = vpop.f32.mrf.mxu1  ;;  %v3288_v22 = vpop.f32.mrf.mxu0 }
 0xba9   :  { %2632 = vst.msk [vmem:[%s4344_s8 + $0x10] sm:$0xf] %vm2261_vm4, %v2629_v19  ;;  %2725 = vst.msk [vmem:[%s4344_s8 + $0x14] sm:$0xf] %vm2261_vm4, %v2722_v37 }
 0xbac   :  { %v3437_v25 = vpop.eup %3436 }
 0xbad   :  { %v2151_v16 = vmul.f32 %v3437_v25, %v2149_v29 }
 0xbae   :  { %v3439_v32 = vpop.eup %3438 }
 0xbaf   :  { %v2152_v33 = vadd.f32 %v2151_v16, %v3891_v24  ;;  %v2154_v28 = vsub.f32 1.0, %v3439_v32  ;;  %v2158_v56 = vmul.f32 %v3439_v32, %v2156_v30 }
 0xbb1   :  { %3440 = vtanh.f32 %v2152_v33 }
 0xbbe   :  { %v3441_v57 = vpop.eup %3440 }
 0xbbf   :  { %v2155_v31 = vmul.f32 %v3441_v57, %v2154_v28 }
 0xbc1   :  { %v2159_v39 = vadd.f32 %v2158_v56, %v2155_v31 }
 0xbc3   :  { %v2818_v41 = vsel %vm2160_vm3, %v2159_v39, 0.0  ;;  %2161 = vst.msk [vmem:[#allocation13 - $0x4] sm:$0xf0] %vm2160_vm3, %v2159_v39  ;;  %v2822_v36 = vmul.f32 %v2159_v39, %v2159_v39 }
 0xbc4   :  { %2819 = vadd.xlane.f32.xlu0 %v2818_v41 }
 0xbc5   :  { %v2823_v54 = vsel %vm2160_vm3, %v2822_v36, 0.0 }
 0xbc8   :  { %2824 = vadd.xlane.f32.xlu0 %v2823_v54 }
 0xc34   :  { %v2813_v55 = vpop.f32.mrf.mxu1 }
 0xc35   :  { %v2814_v24 = vadd.f32 %v2813_v55, %v4282_v58 }
 0xc36   :  { %v3299_v35 = vpop.f32.mrf.mxu1 }
 0xc37   :  { %2817 = vst.msk [vmem:[%s4344_s8 + $0x18] sm:$0xf] %vm2261_vm4, %v2814_v24 }
 0xc4d   :  { %v2820_v47 = vpop.xlane.xlu0 %2819 }
 0xc4e   :  { %v2821_v44 = vmul.f32 0.03125, %v2820_v47 }
 0xc50   :  { %v2827_v60 = vmul.f32 %v2821_v44, %v2821_v44  ;;  %v2830_v2 = vsub.f32 %v2159_v39, %v2821_v44 }
 0xc51   :  { %v2825_v59 = vpop.xlane.xlu0 %2824 }
 0xc52   :  { %v2826_v61 = vmul.f32 0.03125, %v2825_v59 }
 0xc54   :  { %v2828_v63 = vsub.f32 %v2826_v61, %v2827_v60 }
 0xc56   :  { %v2829_v6 = vmax.f32 %v2828_v63, 0.0 }
 0xc58   :  { %v2831_v7 = vadd.f32 1e-05, %v2829_v6 }
 0xc5a   :  { %3442 = vrsqrt.f32 %v2831_v7 }
 0xc67   :  { %v3443_v43 = vpop.eup %3442 }
 0xc68   :  { %v2833_v5 = vmul.f32 %v3443_v43, %v2830_v2 }
 0xc6a   :  { %v2834_v46 = vmul.f32 %v2833_v5, %v4145_v27 }
 0xc6c   :  { %v2835_v49 = vadd.f32 %v2834_v46, %v4171_v0 }
 0xc6e   :  { %v2837_v34 = vrot.slane %v2835_v49, 4 }
 0xc70   :  { %3309 = vmatmul.mubr.msk.f32.vlgmr.msra.gmra.mxu0 %vm118_vm0, %v2837_v34 }
 0xc71   :  { %3576 = shalt.err (!%p3573_p6)
}
 0xc72   :  { %2922 = dma.vmem_to_hbm [thread:$0]  %s2920_s21, 64, %s4345_s9, [#allocation4]  }
 0xd30   :  { %v2906_v27 = vpop.f32.mrf.mxu0 }
 0xd31   :  { %v2907_v0 = vadd.f32 %v2906_v27, %v4282_v58 }
 0xd32   :  { %v3310_v51 = vpop.f32.mrf.mxu0 }
 0xd33   :  { %2910 = vst.msk [vmem:[%s4344_s8 + $0x1c] sm:$0xf] %vm2261_vm4, %v2907_v0 }
 0xd34   :  { %3593 = dma.done.wait [#allocation4], 64  }
 0xd35   :  { %3594 = vsyncadd [#allocation4], 4294967232 }
 0xd36   :  { %2928 = vsyncpa [#allocation3], 1 }
 0xd37   :  { %2929 = vsyncpa [#allocation6], 1 }
 0xd38   :  { %2930 = vsyncpa [#allocation9], 1 }
 0xd39   :  { %2931 = vsyncpa [#allocation12], 1 }
 0xd3a   :  { %2932 = vsyncpa [#allocation4], 1 }

</bundles_post_ra>
